<compile_context>
chip_gen: v7x
topology: tpu7x:2x2x1
jax: 0.10.0
libtpu: 0.0.40
codegen_flags: <defaults>
</compile_context>

<pallas_src>
import functools
import math

import jax
import jax.numpy as jnp
import numpy as np
from jax.experimental import pallas as pl
from jax.experimental.pallas import tpu as pltpu


_CORNERS = ((0, 0), (0, 1), (1, 0), (1, 1))


def _round_up(x, m):
    return ((x + m - 1) // m) * m


def _st_kernel(qstart_ref, qlen_ref, src_ref, coord_ref, out_ref,
               qidx_sc, w_sc, *, H, W, TP, TQ, mm_dtype):
    # qstart_ref/qlen_ref: (N, nP) int32 in SMEM (scalar prefetch)
    # src_ref  : (1, C, TQ)  source-pixel tile (lane-dense flattened image)
    # coord_ref: (1, 2, TP)  pixel-space sample coords (row 0 = y, row 1 = x) for this out tile
    # out_ref  : (1, C, TP)  resident accumulator across the q (source-pixel) grid axis
    # qidx_sc  : (4, TP) int32  per-corner flat source index   (p-only, cached at q == 0)
    # w_sc     : (4, TP) f32    per-corner bilinear weight      (p-only, cached at q == 0)
    n = pl.program_id(0)
    p = pl.program_id(1)
    q = pl.program_id(2)

    # ---- p-only work: bilinear corner indices & weights, computed once per (n, p) tile ----
    @pl.when(q == 0)
    def _():
        c = coord_ref[0]                    # (2, TP)
        y = c[0:1, :]                       # sample row (pixel coords)
        x = c[1:2, :]                       # sample col
        y0 = jnp.floor(y)
        x0 = jnp.floor(x)
        wy = y - y0
        wx = x - x0
        for idx, (dy, dx) in enumerate(_CORNERS):
            yc = y0 + dy
            xc = x0 + dx
            w = (wy if dy else 1.0 - wy) * (wx if dx else 1.0 - wx)      # (1, TP)
            inb = (yc >= 0.0) & (yc <= H - 1.0) & (xc >= 0.0) & (xc <= W - 1.0)
            w = jnp.where(inb, w, 0.0)                                    # padding_mode='zeros'
            qidx = (jnp.clip(yc, 0.0, H - 1.0) * W
                    + jnp.clip(xc, 0.0, W - 1.0)).astype(jnp.int32)       # (1, TP)
            qidx_sc[idx:idx + 1, :] = qidx
            w_sc[idx:idx + 1, :] = w

    qlen = qlen_ref[n, p]
    active = q < qlen        # does this src block overlap the q band needed by this out tile?

    @pl.when(active)
    def _():
        q_lo = (qstart_ref[n, p] + q) * TQ
        q_iota = jax.lax.broadcasted_iota(jnp.int32, (TQ, TP), 0) + q_lo
        # acc[q_src, p_out] = bilinear weight; first corner folded into the definition.
        acc = jnp.where(q_iota == qidx_sc[0:1, :], w_sc[0:1, :], 0.0)
        for idx in range(1, 4):
            acc = acc + jnp.where(q_iota == qidx_sc[idx:idx + 1, :],
                                  w_sc[idx:idx + 1, :], 0.0)
        # out[c, p] += sum_q src[c, q] * acc[q, p]  -> single MXU pass, lane-dense output.
        contrib = jax.lax.dot_general(
            src_ref[0].astype(mm_dtype), acc.astype(mm_dtype),
            dimension_numbers=(((1,), (0,)), ((), ())),
            preferred_element_type=jnp.float32)                           # (C, TP)

        @pl.when(q == 0)
        def _():
            out_ref[0] = contrib

        @pl.when(q != 0)
        def _():
            out_ref[0] = out_ref[0] + contrib

    # Output tiles whose samples are all out of bounds still need a zero init.
    @pl.when(jnp.logical_not(active) & (q == 0))
    def _():
        out_ref[0] = jnp.zeros(out_ref.shape[1:], out_ref.dtype)


def _q_block_ranges(coords, H, W, TP, TQ, nQ):
    """Per (batch, output-pixel-tile) range of source-pixel blocks touched by the sampling."""
    N, _, Ppad = coords.shape
    y = coords[:, 0, :]
    x = coords[:, 1, :]
    y0 = jnp.floor(y)
    x0 = jnp.floor(x)
    big = jnp.iinfo(jnp.int32).max
    qmin = jnp.full((N, Ppad), big, jnp.int32)
    qmax = jnp.full((N, Ppad), -1, jnp.int32)
    for dy, dx in _CORNERS:
        yc = y0 + dy
        xc = x0 + dx
        inb = (yc >= 0) & (yc <= H - 1) & (xc >= 0) & (xc <= W - 1)
        qidx = (jnp.clip(yc, 0, H - 1) * W + jnp.clip(xc, 0, W - 1)).astype(jnp.int32)
        qmin = jnp.where(inb, jnp.minimum(qmin, qidx), qmin)
        qmax = jnp.where(inb, jnp.maximum(qmax, qidx), qmax)
    nP = Ppad // TP
    qmin = qmin.reshape(N, nP, TP).min(axis=-1)
    qmax = qmax.reshape(N, nP, TP).max(axis=-1)
    has_any = qmax >= 0
    q_start = jnp.clip(qmin // TQ, 0, nQ - 1)
    q_end = jnp.clip(qmax // TQ, 0, nQ - 1)
    q_len = jnp.where(has_any, q_end - q_start + 1, 0)
    q_start = jnp.where(has_any, q_start, 0)
    return q_start.astype(jnp.int32), q_len.astype(jnp.int32)


def spatial_transformer(src, flow, *, tp_target=256, tq_target=128, use_bf16_matmul=False):
    """src: (N, C, H, W), flow: (N, 2, H, W) NCHW pixel displacements. Bilinear, zero padding."""
    N, C, H, W = src.shape
    assert flow.shape == (N, 2, H, W)
    P = H * W

    # Lane-aligned tiles; TQ*TP kept small enough that the (TQ, TP) weight block does not spill.
    TP = min(_round_up(tp_target, 128), _round_up(P, 128))
    TQ = min(_round_up(tq_target, 128), _round_up(P, 128))
    lcm = TP * TQ // math.gcd(TP, TQ)
    Ppad = _round_up(P, lcm)
    nP = Ppad // TP
    nQ = Ppad // TQ
    pad = Ppad - P

    # Sample coordinates in pixel space: the module's [-1,1] normalization followed by
    # grid_sample(align_corners=True)'s un-normalization is the identity on pixel coords,
    # so new_locs = base_grid + flow directly (base-grid add done once here, not per q step).
    ii = jnp.arange(H, dtype=jnp.float32)[:, None]
    jj = jnp.arange(W, dtype=jnp.float32)[None, :]
    y = (ii[None] + flow[:, 0].astype(jnp.float32)).reshape(N, P)
    x = (jj[None] + flow[:, 1].astype(jnp.float32)).reshape(N, P)
    if pad:
        # Padded output lanes sample fully out of bounds -> all corner weights 0 -> output 0.
        y = jnp.pad(y, ((0, 0), (0, pad)), constant_values=-2.0)
        x = jnp.pad(x, ((0, 0), (0, pad)), constant_values=-2.0)
    coords = jnp.stack([y, x], axis=1)                        # (N, 2, Ppad), lane-dense

    src_r = src.reshape(N, C, P)                              # keep incoming dtype (no upcast)
    if pad:
        src_r = jnp.pad(src_r, ((0, 0), (0, 0), (0, pad)))

    # Per-tile source-pixel block ranges (scalar prefetch): skip q tiles that cannot hit.
    q_start, q_len = _q_block_ranges(coords, H, W, TP, TQ, nQ)

    # Static q-step count: tight bound when flow is concrete, worst case under tracing.
    try:
        q_steps = max(int(jax.device_get(jnp.max(q_len))), 1)
    except jax.errors.ConcretizationTypeError:
        q_steps = nQ

    mm_dtype = jnp.bfloat16 if use_bf16_matmul else jnp.float32
    kernel = functools.partial(_st_kernel, H=H, W=W, TP=TP, TQ=TQ, mm_dtype=mm_dtype)

    out_r = pl.pallas_call(
        kernel,
        out_shape=jax.ShapeDtypeStruct((N, C, Ppad), jnp.float32),
        grid_spec=pltpu.PrefetchScalarGridSpec(
            num_scalar_prefetch=2,
            grid=(N, nP, q_steps),                            # q (reduction) innermost
            in_specs=[
                # Only the needed band of source blocks is streamed; the clamp keeps the
                # block index constant (so no re-DMA) on steps the kernel skips.
                pl.BlockSpec((1, C, TQ),
                             lambda n, p, q, qs, ql: (n, 0, jnp.minimum(qs[n, p] + q, nQ - 1))),
                pl.BlockSpec((1, 2, TP), lambda n, p, q, qs, ql: (n, 0, p)),
            ],
            out_specs=pl.BlockSpec((1, C, TP), lambda n, p, q, qs, ql: (n, 0, p)),
            scratch_shapes=[
                pltpu.VMEM((4, TP), jnp.int32),    # cached per-corner source indices
                pltpu.VMEM((4, TP), jnp.float32),  # cached per-corner bilinear weights
            ],
        ),
        compiler_params=pltpu.CompilerParams(
            dimension_semantics=("parallel", "parallel", "arbitrary")),
    )(q_start, q_len, src_r, coords)

    out = out_r[:, :, :P].reshape(N, C, H, W)
    return out.astype(src.dtype)


def _reference(src, flow):
    """Pure-JAX reference of grid_sample(align_corners=True, bilinear, zero padding)."""
    N, C, H, W = src.shape
    ii, jj = jnp.meshgrid(jnp.arange(H, dtype=jnp.float32),
                          jnp.arange(W, dtype=jnp.float32), indexing="ij")
    y = ii[None] + flow[:, 0]
    x = jj[None] + flow[:, 1]
    y0 = jnp.floor(y)
    x0 = jnp.floor(x)
    wy = y - y0
    wx = x - x0
    out = jnp.zeros_like(src)
    bidx = jnp.arange(N)[:, None, None, None]
    cidx = jnp.arange(C)[None, :, None, None]
    for dy in (0, 1):
        for dx in (0, 1):
            yc = y0 + dy
            xc = x0 + dx
            w = (wy if dy else 1.0 - wy) * (wx if dx else 1.0 - wx)
            inb = (yc >= 0) & (yc <= H - 1) & (xc >= 0) & (xc <= W - 1)
            w = jnp.where(inb, w, 0.0)
            yi = jnp.clip(yc, 0, H - 1).astype(jnp.int32)
            xi = jnp.clip(xc, 0, W - 1).astype(jnp.int32)
            gathered = src[bidx, cidx, yi[:, None], xi[:, None]]
            out = out + w[:, None] * gathered
    return out


if __name__ == "__main__":
    key = jax.random.PRNGKey(0)
    k1, k2 = jax.random.split(key)
    N, C, H, W = 2, 4, 16, 16
    src = jax.random.normal(k1, (N, C, H, W), dtype=jnp.float32)
    # Displacement field: a few pixels of motion, including some out-of-bounds samples.
    flow = 3.0 * jax.random.normal(k2, (N, 2, H, W), dtype=jnp.float32)

    out = jax.block_until_ready(spatial_transformer(src, flow))
    ref = jax.block_until_ready(_reference(src, flow))
    np.testing.assert_allclose(np.asarray(out), np.asarray(ref), atol=1e-4, rtol=1e-4)

    print("KERNEL_OK")
</pallas_src>

<mosaic_0001>
module attributes {stable_mosaic.version = 11 : i64} {
  func.func @_st_kernel(%arg0: i32, %arg1: i32, %arg2: i32, %arg3: memref<2x1xi32, #tpu.memory_space<smem>>, %arg4: memref<2x1xi32, #tpu.memory_space<smem>>, %arg5: memref<1x4x128xf32, #tpu.memory_space<vmem>>, %arg6: memref<1x2x256xf32, #tpu.memory_space<vmem>>, %arg7: memref<1x4x256xf32, #tpu.memory_space<vmem>>, %arg8: memref<4x256xi32, #tpu.memory_space<vmem>>, %arg9: memref<4x256xf32, #tpu.memory_space<vmem>>) attributes {dimension_semantics = [#tpu.dimension_semantics<parallel>, #tpu.dimension_semantics<parallel>, #tpu.dimension_semantics<arbitrary>], iteration_bounds = array<i64: 2, 1, 2>, scalar_prefetch = 2 : i64, scratch_operands = 2 : i64, tpu.core_type = #tpu.core_type<tc>, window_params = [{transform_indices = @transform_0, window_bounds = array<i64: 1, 4, 128>}, {transform_indices = @transform_1, window_bounds = array<i64: 1, 2, 256>}, {transform_indices = @transform_2, window_bounds = array<i64: 1, 4, 256>}]} {
    %c0_i32 = arith.constant 0 : i32
    %0 = arith.cmpi eq, %arg2, %c0_i32 : i32
    %1 = arith.extui %0 : i1 to i32
    %c0_i32_0 = arith.constant 0 : i32
    %2 = arith.cmpi ne, %1, %c0_i32_0 : i32
    scf.if %2 {
      %c0 = arith.constant 0 : index
      %c0_4 = arith.constant 0 : index
      %c0_5 = arith.constant 0 : index
      %14 = vector.load %arg6[%c0, %c0_4, %c0_5] : memref<1x2x256xf32, #tpu.memory_space<vmem>>, vector<1x2x256xf32>
      %15 = vector.shape_cast %14 : vector<1x2x256xf32> to vector<2x256xf32>
      %16 = vector.extract_strided_slice %15 {offsets = [0, 0], sizes = [1, 256], strides = [1, 1]} : vector<2x256xf32> to vector<1x256xf32>
      %17 = vector.extract_strided_slice %15 {offsets = [1, 0], sizes = [1, 256], strides = [1, 1]} : vector<2x256xf32> to vector<1x256xf32>
      %18 = math.floor %16 : vector<1x256xf32>
      %19 = math.floor %17 : vector<1x256xf32>
      %20 = arith.subf %16, %18 : vector<1x256xf32>
      %21 = arith.subf %17, %19 : vector<1x256xf32>
      %cst = arith.constant 0.000000e+00 : f32
      %22 = vector.broadcast %cst : f32 to vector<1x256xf32>
      %23 = arith.addf %18, %22 : vector<1x256xf32>
      %cst_6 = arith.constant 0.000000e+00 : f32
      %24 = vector.broadcast %cst_6 : f32 to vector<1x256xf32>
      %25 = arith.addf %19, %24 : vector<1x256xf32>
      %cst_7 = arith.constant 1.000000e+00 : f32
      %26 = vector.broadcast %cst_7 : f32 to vector<1x256xf32>
      %27 = arith.subf %26, %20 : vector<1x256xf32>
      %cst_8 = arith.constant 1.000000e+00 : f32
      %28 = vector.broadcast %cst_8 : f32 to vector<1x256xf32>
      %29 = arith.subf %28, %21 : vector<1x256xf32>
      %30 = arith.mulf %27, %29 : vector<1x256xf32>
      %cst_9 = arith.constant 0.000000e+00 : f32
      %31 = vector.broadcast %cst_9 : f32 to vector<1x256xf32>
      %32 = arith.cmpf oge, %23, %31 : vector<1x256xf32>
      %cst_10 = arith.constant 1.500000e+01 : f32
      %33 = vector.broadcast %cst_10 : f32 to vector<1x256xf32>
      %34 = arith.cmpf ole, %23, %33 : vector<1x256xf32>
      %35 = arith.andi %32, %34 : vector<1x256xi1>
      %cst_11 = arith.constant 0.000000e+00 : f32
      %36 = vector.broadcast %cst_11 : f32 to vector<1x256xf32>
      %37 = arith.cmpf oge, %25, %36 : vector<1x256xf32>
      %38 = arith.andi %35, %37 : vector<1x256xi1>
      %cst_12 = arith.constant 1.500000e+01 : f32
      %39 = vector.broadcast %cst_12 : f32 to vector<1x256xf32>
      %40 = arith.cmpf ole, %25, %39 : vector<1x256xf32>
      %41 = arith.andi %38, %40 : vector<1x256xi1>
      %cst_13 = arith.constant 0.000000e+00 : f32
      %42 = vector.broadcast %cst_13 : f32 to vector<1x256xf32>
      %43 = arith.select %41, %30, %42 : vector<1x256xi1>, vector<1x256xf32>
      %cst_14 = arith.constant 0.000000e+00 : f32
      %cst_15 = arith.constant 1.500000e+01 : f32
      %44 = vector.broadcast %cst_14 : f32 to vector<1x256xf32>
      %45 = arith.maximumf %44, %23 : vector<1x256xf32>
      %46 = vector.broadcast %cst_15 : f32 to vector<1x256xf32>
      %47 = arith.minimumf %46, %45 : vector<1x256xf32>
      %cst_16 = arith.constant 1.600000e+01 : f32
      %48 = vector.broadcast %cst_16 : f32 to vector<1x256xf32>
      %49 = arith.mulf %47, %48 : vector<1x256xf32>
      %cst_17 = arith.constant 0.000000e+00 : f32
      %cst_18 = arith.constant 1.500000e+01 : f32
      %50 = vector.broadcast %cst_17 : f32 to vector<1x256xf32>
      %51 = arith.maximumf %50, %25 : vector<1x256xf32>
      %52 = vector.broadcast %cst_18 : f32 to vector<1x256xf32>
      %53 = arith.minimumf %52, %51 : vector<1x256xf32>
      %54 = arith.addf %49, %53 : vector<1x256xf32>
      %55 = arith.fptosi %54 : vector<1x256xf32> to vector<1x256xi32>
      %c0_19 = arith.constant 0 : index
      %c0_20 = arith.constant 0 : index
      %56 = vector.load %arg8[%c0_19, %c0_20] : memref<4x256xi32, #tpu.memory_space<vmem>>, vector<1x256xi32>
      tpu.vector_store %arg8[%c0_19, %c0_20], %55 {strides = array<i32>} : memref<4x256xi32, #tpu.memory_space<vmem>>, vector<1x256xi32>,
      %c0_21 = arith.constant 0 : index
      %c0_22 = arith.constant 0 : index
      %57 = vector.load %arg9[%c0_21, %c0_22] : memref<4x256xf32, #tpu.memory_space<vmem>>, vector<1x256xf32>
      tpu.vector_store %arg9[%c0_21, %c0_22], %43 {strides = array<i32>} : memref<4x256xf32, #tpu.memory_space<vmem>>, vector<1x256xf32>,
      %cst_23 = arith.constant 0.000000e+00 : f32
      %58 = vector.broadcast %cst_23 : f32 to vector<1x256xf32>
      %59 = arith.addf %18, %58 : vector<1x256xf32>
      %cst_24 = arith.constant 1.000000e+00 : f32
      %60 = vector.broadcast %cst_24 : f32 to vector<1x256xf32>
      %61 = arith.addf %19, %60 : vector<1x256xf32>
      %cst_25 = arith.constant 1.000000e+00 : f32
      %62 = vector.broadcast %cst_25 : f32 to vector<1x256xf32>
      %63 = arith.subf %62, %20 : vector<1x256xf32>
      %64 = arith.mulf %63, %21 : vector<1x256xf32>
      %cst_26 = arith.constant 0.000000e+00 : f32
      %65 = vector.broadcast %cst_26 : f32 to vector<1x256xf32>
      %66 = arith.cmpf oge, %59, %65 : vector<1x256xf32>
      %cst_27 = arith.constant 1.500000e+01 : f32
      %67 = vector.broadcast %cst_27 : f32 to vector<1x256xf32>
      %68 = arith.cmpf ole, %59, %67 : vector<1x256xf32>
      %69 = arith.andi %66, %68 : vector<1x256xi1>
      %cst_28 = arith.constant 0.000000e+00 : f32
      %70 = vector.broadcast %cst_28 : f32 to vector<1x256xf32>
      %71 = arith.cmpf oge, %61, %70 : vector<1x256xf32>
      %72 = arith.andi %69, %71 : vector<1x256xi1>
      %cst_29 = arith.constant 1.500000e+01 : f32
      %73 = vector.broadcast %cst_29 : f32 to vector<1x256xf32>
      %74 = arith.cmpf ole, %61, %73 : vector<1x256xf32>
      %75 = arith.andi %72, %74 : vector<1x256xi1>
      %cst_30 = arith.constant 0.000000e+00 : f32
      %76 = vector.broadcast %cst_30 : f32 to vector<1x256xf32>
      %77 = arith.select %75, %64, %76 : vector<1x256xi1>, vector<1x256xf32>
      %cst_31 = arith.constant 0.000000e+00 : f32
      %cst_32 = arith.constant 1.500000e+01 : f32
      %78 = vector.broadcast %cst_31 : f32 to vector<1x256xf32>
      %79 = arith.maximumf %78, %59 : vector<1x256xf32>
      %80 = vector.broadcast %cst_32 : f32 to vector<1x256xf32>
      %81 = arith.minimumf %80, %79 : vector<1x256xf32>
      %cst_33 = arith.constant 1.600000e+01 : f32
      %82 = vector.broadcast %cst_33 : f32 to vector<1x256xf32>
      %83 = arith.mulf %81, %82 : vector<1x256xf32>
      %cst_34 = arith.constant 0.000000e+00 : f32
      %cst_35 = arith.constant 1.500000e+01 : f32
      %84 = vector.broadcast %cst_34 : f32 to vector<1x256xf32>
      %85 = arith.maximumf %84, %61 : vector<1x256xf32>
      %86 = vector.broadcast %cst_35 : f32 to vector<1x256xf32>
      %87 = arith.minimumf %86, %85 : vector<1x256xf32>
      %88 = arith.addf %83, %87 : vector<1x256xf32>
      %89 = arith.fptosi %88 : vector<1x256xf32> to vector<1x256xi32>
      %c1 = arith.constant 1 : index
      %c0_36 = arith.constant 0 : index
      %90 = vector.load %arg8[%c1, %c0_36] : memref<4x256xi32, #tpu.memory_space<vmem>>, vector<1x256xi32>
      tpu.vector_store %arg8[%c1, %c0_36], %89 {strides = array<i32>} : memref<4x256xi32, #tpu.memory_space<vmem>>, vector<1x256xi32>,
      %c1_37 = arith.constant 1 : index
      %c0_38 = arith.constant 0 : index
      %91 = vector.load %arg9[%c1_37, %c0_38] : memref<4x256xf32, #tpu.memory_space<vmem>>, vector<1x256xf32>
      tpu.vector_store %arg9[%c1_37, %c0_38], %77 {strides = array<i32>} : memref<4x256xf32, #tpu.memory_space<vmem>>, vector<1x256xf32>,
      %cst_39 = arith.constant 1.000000e+00 : f32
      %92 = vector.broadcast %cst_39 : f32 to vector<1x256xf32>
      %93 = arith.addf %18, %92 : vector<1x256xf32>
      %cst_40 = arith.constant 0.000000e+00 : f32
      %94 = vector.broadcast %cst_40 : f32 to vector<1x256xf32>
      %95 = arith.addf %19, %94 : vector<1x256xf32>
      %cst_41 = arith.constant 1.000000e+00 : f32
      %96 = vector.broadcast %cst_41 : f32 to vector<1x256xf32>
      %97 = arith.subf %96, %21 : vector<1x256xf32>
      %98 = arith.mulf %20, %97 : vector<1x256xf32>
      %cst_42 = arith.constant 0.000000e+00 : f32
      %99 = vector.broadcast %cst_42 : f32 to vector<1x256xf32>
      %100 = arith.cmpf oge, %93, %99 : vector<1x256xf32>
      %cst_43 = arith.constant 1.500000e+01 : f32
      %101 = vector.broadcast %cst_43 : f32 to vector<1x256xf32>
      %102 = arith.cmpf ole, %93, %101 : vector<1x256xf32>
      %103 = arith.andi %100, %102 : vector<1x256xi1>
      %cst_44 = arith.constant 0.000000e+00 : f32
      %104 = vector.broadcast %cst_44 : f32 to vector<1x256xf32>
      %105 = arith.cmpf oge, %95, %104 : vector<1x256xf32>
      %106 = arith.andi %103, %105 : vector<1x256xi1>
      %cst_45 = arith.constant 1.500000e+01 : f32
      %107 = vector.broadcast %cst_45 : f32 to vector<1x256xf32>
      %108 = arith.cmpf ole, %95, %107 : vector<1x256xf32>
      %109 = arith.andi %106, %108 : vector<1x256xi1>
      %cst_46 = arith.constant 0.000000e+00 : f32
      %110 = vector.broadcast %cst_46 : f32 to vector<1x256xf32>
      %111 = arith.select %109, %98, %110 : vector<1x256xi1>, vector<1x256xf32>
      %cst_47 = arith.constant 0.000000e+00 : f32
      %cst_48 = arith.constant 1.500000e+01 : f32
      %112 = vector.broadcast %cst_47 : f32 to vector<1x256xf32>
      %113 = arith.maximumf %112, %93 : vector<1x256xf32>
      %114 = vector.broadcast %cst_48 : f32 to vector<1x256xf32>
      %115 = arith.minimumf %114, %113 : vector<1x256xf32>
      %cst_49 = arith.constant 1.600000e+01 : f32
      %116 = vector.broadcast %cst_49 : f32 to vector<1x256xf32>
      %117 = arith.mulf %115, %116 : vector<1x256xf32>
      %cst_50 = arith.constant 0.000000e+00 : f32
      %cst_51 = arith.constant 1.500000e+01 : f32
      %118 = vector.broadcast %cst_50 : f32 to vector<1x256xf32>
      %119 = arith.maximumf %118, %95 : vector<1x256xf32>
      %120 = vector.broadcast %cst_51 : f32 to vector<1x256xf32>
      %121 = arith.minimumf %120, %119 : vector<1x256xf32>
      %122 = arith.addf %117, %121 : vector<1x256xf32>
      %123 = arith.fptosi %122 : vector<1x256xf32> to vector<1x256xi32>
      %c2 = arith.constant 2 : index
      %c0_52 = arith.constant 0 : index
      %124 = vector.load %arg8[%c2, %c0_52] : memref<4x256xi32, #tpu.memory_space<vmem>>, vector<1x256xi32>
      tpu.vector_store %arg8[%c2, %c0_52], %123 {strides = array<i32>} : memref<4x256xi32, #tpu.memory_space<vmem>>, vector<1x256xi32>,
      %c2_53 = arith.constant 2 : index
      %c0_54 = arith.constant 0 : index
      %125 = vector.load %arg9[%c2_53, %c0_54] : memref<4x256xf32, #tpu.memory_space<vmem>>, vector<1x256xf32>
      tpu.vector_store %arg9[%c2_53, %c0_54], %111 {strides = array<i32>} : memref<4x256xf32, #tpu.memory_space<vmem>>, vector<1x256xf32>,
      %cst_55 = arith.constant 1.000000e+00 : f32
      %126 = vector.broadcast %cst_55 : f32 to vector<1x256xf32>
      %127 = arith.addf %18, %126 : vector<1x256xf32>
      %cst_56 = arith.constant 1.000000e+00 : f32
      %128 = vector.broadcast %cst_56 : f32 to vector<1x256xf32>
      %129 = arith.addf %19, %128 : vector<1x256xf32>
      %130 = arith.mulf %20, %21 : vector<1x256xf32>
      %cst_57 = arith.constant 0.000000e+00 : f32
      %131 = vector.broadcast %cst_57 : f32 to vector<1x256xf32>
      %132 = arith.cmpf oge, %127, %131 : vector<1x256xf32>
      %cst_58 = arith.constant 1.500000e+01 : f32
      %133 = vector.broadcast %cst_58 : f32 to vector<1x256xf32>
      %134 = arith.cmpf ole, %127, %133 : vector<1x256xf32>
      %135 = arith.andi %132, %134 : vector<1x256xi1>
      %cst_59 = arith.constant 0.000000e+00 : f32
      %136 = vector.broadcast %cst_59 : f32 to vector<1x256xf32>
      %137 = arith.cmpf oge, %129, %136 : vector<1x256xf32>
      %138 = arith.andi %135, %137 : vector<1x256xi1>
      %cst_60 = arith.constant 1.500000e+01 : f32
      %139 = vector.broadcast %cst_60 : f32 to vector<1x256xf32>
      %140 = arith.cmpf ole, %129, %139 : vector<1x256xf32>
      %141 = arith.andi %138, %140 : vector<1x256xi1>
      %cst_61 = arith.constant 0.000000e+00 : f32
      %142 = vector.broadcast %cst_61 : f32 to vector<1x256xf32>
      %143 = arith.select %141, %130, %142 : vector<1x256xi1>, vector<1x256xf32>
      %cst_62 = arith.constant 0.000000e+00 : f32
      %cst_63 = arith.constant 1.500000e+01 : f32
      %144 = vector.broadcast %cst_62 : f32 to vector<1x256xf32>
      %145 = arith.maximumf %144, %127 : vector<1x256xf32>
      %146 = vector.broadcast %cst_63 : f32 to vector<1x256xf32>
      %147 = arith.minimumf %146, %145 : vector<1x256xf32>
      %cst_64 = arith.constant 1.600000e+01 : f32
      %148 = vector.broadcast %cst_64 : f32 to vector<1x256xf32>
      %149 = arith.mulf %147, %148 : vector<1x256xf32>
      %cst_65 = arith.constant 0.000000e+00 : f32
      %cst_66 = arith.constant 1.500000e+01 : f32
      %150 = vector.broadcast %cst_65 : f32 to vector<1x256xf32>
      %151 = arith.maximumf %150, %129 : vector<1x256xf32>
      %152 = vector.broadcast %cst_66 : f32 to vector<1x256xf32>
      %153 = arith.minimumf %152, %151 : vector<1x256xf32>
      %154 = arith.addf %149, %153 : vector<1x256xf32>
      %155 = arith.fptosi %154 : vector<1x256xf32> to vector<1x256xi32>
      %c3 = arith.constant 3 : index
      %c0_67 = arith.constant 0 : index
      %156 = vector.load %arg8[%c3, %c0_67] : memref<4x256xi32, #tpu.memory_space<vmem>>, vector<1x256xi32>
      tpu.vector_store %arg8[%c3, %c0_67], %155 {strides = array<i32>} : memref<4x256xi32, #tpu.memory_space<vmem>>, vector<1x256xi32>,
      %c3_68 = arith.constant 3 : index
      %c0_69 = arith.constant 0 : index
      %157 = vector.load %arg9[%c3_68, %c0_69] : memref<4x256xf32, #tpu.memory_space<vmem>>, vector<1x256xf32>
      tpu.vector_store %arg9[%c3_68, %c0_69], %143 {strides = array<i32>} : memref<4x256xf32, #tpu.memory_space<vmem>>, vector<1x256xf32>,
    } else {
    }
    %3 = arith.index_cast %arg0 : i32 to index
    %4 = arith.index_cast %arg1 : i32 to index
    %5 = memref.load %arg4[%3, %4] : memref<2x1xi32, #tpu.memory_space<smem>>
    %6 = arith.cmpi slt, %arg2, %5 : i32
    %7 = arith.extui %6 : i1 to i32
    %c0_i32_1 = arith.constant 0 : i32
    %8 = arith.cmpi ne, %7, %c0_i32_1 : i32
    scf.if %8 {
      %14 = arith.index_cast %arg0 : i32 to index
      %15 = arith.index_cast %arg1 : i32 to index
      %16 = memref.load %arg3[%14, %15] : memref<2x1xi32, #tpu.memory_space<smem>>
      %17 = arith.addi %16, %arg2 : i32
      %c128_i32 = arith.constant 128 : i32
      %18 = arith.muli %17, %c128_i32 : i32
      %19 = tpu.iota {dimensions = array<i32: 0>} : vector<128x256xi32>
      %20 = vector.broadcast %18 : i32 to vector<128x256xi32>
      %21 = arith.addi %19, %20 : vector<128x256xi32>
      %c0 = arith.constant 0 : index
      %c0_4 = arith.constant 0 : index
      %22 = vector.load %arg8[%c0, %c0_4] : memref<4x256xi32, #tpu.memory_space<vmem>>, vector<1x256xi32>
      %23 = vector.broadcast %22 : vector<1x256xi32> to vector<128x256xi32>
      %24 = arith.cmpi eq, %21, %23 : vector<128x256xi32>
      %c0_5 = arith.constant 0 : index
      %c0_6 = arith.constant 0 : index
      %25 = vector.load %arg9[%c0_5, %c0_6] : memref<4x256xf32, #tpu.memory_space<vmem>>, vector<1x256xf32>
      %cst = arith.constant 0.000000e+00 : f32
      %26 = vector.shape_cast %25 : vector<1x256xf32> to vector<1x256xf32>
      %27 = vector.broadcast %26 : vector<1x256xf32> to vector<128x256xf32>
      %28 = vector.broadcast %cst : f32 to vector<128x256xf32>
      %29 = arith.select %24, %27, %28 : vector<128x256xi1>, vector<128x256xf32>
      %c1 = arith.constant 1 : index
      %c0_7 = arith.constant 0 : index
      %30 = vector.load %arg8[%c1, %c0_7] : memref<4x256xi32, #tpu.memory_space<vmem>>, vector<1x256xi32>
      %31 = vector.broadcast %30 : vector<1x256xi32> to vector<128x256xi32>
      %32 = arith.cmpi eq, %21, %31 : vector<128x256xi32>
      %c1_8 = arith.constant 1 : index
      %c0_9 = arith.constant 0 : index
      %33 = vector.load %arg9[%c1_8, %c0_9] : memref<4x256xf32, #tpu.memory_space<vmem>>, vector<1x256xf32>
      %cst_10 = arith.constant 0.000000e+00 : f32
      %34 = vector.shape_cast %33 : vector<1x256xf32> to vector<1x256xf32>
      %35 = vector.broadcast %34 : vector<1x256xf32> to vector<128x256xf32>
      %36 = vector.broadcast %cst_10 : f32 to vector<128x256xf32>
      %37 = arith.select %32, %35, %36 : vector<128x256xi1>, vector<128x256xf32>
      %38 = arith.addf %29, %37 : vector<128x256xf32>
      %c2 = arith.constant 2 : index
      %c0_11 = arith.constant 0 : index
      %39 = vector.load %arg8[%c2, %c0_11] : memref<4x256xi32, #tpu.memory_space<vmem>>, vector<1x256xi32>
      %40 = vector.broadcast %39 : vector<1x256xi32> to vector<128x256xi32>
      %41 = arith.cmpi eq, %21, %40 : vector<128x256xi32>
      %c2_12 = arith.constant 2 : index
      %c0_13 = arith.constant 0 : index
      %42 = vector.load %arg9[%c2_12, %c0_13] : memref<4x256xf32, #tpu.memory_space<vmem>>, vector<1x256xf32>
      %cst_14 = arith.constant 0.000000e+00 : f32
      %43 = vector.shape_cast %42 : vector<1x256xf32> to vector<1x256xf32>
      %44 = vector.broadcast %43 : vector<1x256xf32> to vector<128x256xf32>
      %45 = vector.broadcast %cst_14 : f32 to vector<128x256xf32>
      %46 = arith.select %41, %44, %45 : vector<128x256xi1>, vector<128x256xf32>
      %47 = arith.addf %38, %46 : vector<128x256xf32>
      %c3 = arith.constant 3 : index
      %c0_15 = arith.constant 0 : index
      %48 = vector.load %arg8[%c3, %c0_15] : memref<4x256xi32, #tpu.memory_space<vmem>>, vector<1x256xi32>
      %49 = vector.broadcast %48 : vector<1x256xi32> to vector<128x256xi32>
      %50 = arith.cmpi eq, %21, %49 : vector<128x256xi32>
      %c3_16 = arith.constant 3 : index
      %c0_17 = arith.constant 0 : index
      %51 = vector.load %arg9[%c3_16, %c0_17] : memref<4x256xf32, #tpu.memory_space<vmem>>, vector<1x256xf32>
      %cst_18 = arith.constant 0.000000e+00 : f32
      %52 = vector.shape_cast %51 : vector<1x256xf32> to vector<1x256xf32>
      %53 = vector.broadcast %52 : vector<1x256xf32> to vector<128x256xf32>
      %54 = vector.broadcast %cst_18 : f32 to vector<128x256xf32>
      %55 = arith.select %50, %53, %54 : vector<128x256xi1>, vector<128x256xf32>
      %56 = arith.addf %47, %55 : vector<128x256xf32>
      %c0_19 = arith.constant 0 : index
      %c0_20 = arith.constant 0 : index
      %c0_21 = arith.constant 0 : index
      %57 = vector.load %arg5[%c0_19, %c0_20, %c0_21] : memref<1x4x128xf32, #tpu.memory_space<vmem>>, vector<1x4x128xf32>
      %58 = vector.shape_cast %57 : vector<1x4x128xf32> to vector<4x128xf32>
      %cst_22 = arith.constant dense<0.000000e+00> : vector<4x256xf32>
      %59 = tpu.matmul %58, %56, %cst_22 {dimension_numbers = #tpu.dot_dimension_numbers<[1], [0], [0], [1], [0, 0, 1, 1], [], []>} : vector<4x128xf32>, vector<128x256xf32>, vector<4x256xf32> -> vector<4x256xf32>
      %c0_i32_23 = arith.constant 0 : i32
      %60 = arith.cmpi eq, %arg2, %c0_i32_23 : i32
      %61 = arith.extui %60 : i1 to i32
      %c0_i32_24 = arith.constant 0 : i32
      %62 = arith.cmpi ne, %61, %c0_i32_24 : i32
      scf.if %62 {
        %c0_27 = arith.constant 0 : index
        %c0_28 = arith.constant 0 : index
        %c0_29 = arith.constant 0 : index
        %66 = vector.load %arg7[%c0_27, %c0_28, %c0_29] : memref<1x4x256xf32, #tpu.memory_space<vmem>>, vector<1x4x256xf32>
        %67 = vector.shape_cast %66 : vector<1x4x256xf32> to vector<4x256xf32>
        %68 = vector.shape_cast %59 : vector<4x256xf32> to vector<1x4x256xf32>
        tpu.vector_store %arg7[%c0_27, %c0_28, %c0_29], %68 {strides = array<i32>} : memref<1x4x256xf32, #tpu.memory_space<vmem>>, vector<1x4x256xf32>,
      } else {
      }
      %c0_i32_25 = arith.constant 0 : i32
      %63 = arith.cmpi ne, %arg2, %c0_i32_25 : i32
      %64 = arith.extui %63 : i1 to i32
      %c0_i32_26 = arith.constant 0 : i32
      %65 = arith.cmpi ne, %64, %c0_i32_26 : i32
      scf.if %65 {
        %c0_27 = arith.constant 0 : index
        %c0_28 = arith.constant 0 : index
        %c0_29 = arith.constant 0 : index
        %66 = vector.load %arg7[%c0_27, %c0_28, %c0_29] : memref<1x4x256xf32, #tpu.memory_space<vmem>>, vector<1x4x256xf32>
        %67 = vector.shape_cast %66 : vector<1x4x256xf32> to vector<4x256xf32>
        %68 = arith.addf %67, %59 : vector<4x256xf32>
        %c0_30 = arith.constant 0 : index
        %c0_31 = arith.constant 0 : index
        %c0_32 = arith.constant 0 : index
        %69 = vector.load %arg7[%c0_30, %c0_31, %c0_32] : memref<1x4x256xf32, #tpu.memory_space<vmem>>, vector<1x4x256xf32>
        %70 = vector.shape_cast %69 : vector<1x4x256xf32> to vector<4x256xf32>
        %71 = vector.shape_cast %68 : vector<4x256xf32> to vector<1x4x256xf32>
        tpu.vector_store %arg7[%c0_30, %c0_31, %c0_32], %71 {strides = array<i32>} : memref<1x4x256xf32, #tpu.memory_space<vmem>>, vector<1x4x256xf32>,
      } else {
      }
    } else {
    }
    %true = arith.constant true
    %9 = arith.xori %6, %true : i1
    %c0_i32_2 = arith.constant 0 : i32
    %10 = arith.cmpi eq, %arg2, %c0_i32_2 : i32
    %11 = arith.andi %9, %10 : i1
    %12 = arith.extui %11 : i1 to i32
    %c0_i32_3 = arith.constant 0 : i32
    %13 = arith.cmpi ne, %12, %c0_i32_3 : i32
    scf.if %13 {
      %cst = arith.constant 0.000000e+00 : f32
      %14 = vector.broadcast %cst : f32 to vector<4x256xf32>
      %c0 = arith.constant 0 : index
      %c0_4 = arith.constant 0 : index
      %c0_5 = arith.constant 0 : index
      %15 = vector.load %arg7[%c0, %c0_4, %c0_5] : memref<1x4x256xf32, #tpu.memory_space<vmem>>, vector<1x4x256xf32>
      %16 = vector.shape_cast %15 : vector<1x4x256xf32> to vector<4x256xf32>
      %17 = vector.shape_cast %14 : vector<4x256xf32> to vector<1x4x256xf32>
      tpu.vector_store %arg7[%c0, %c0_4, %c0_5], %17 {strides = array<i32>} : memref<1x4x256xf32, #tpu.memory_space<vmem>>, vector<1x4x256xf32>,
    } else {
    }
    return
  }
  func.func @transform_0(%arg0: i32, %arg1: i32, %arg2: i32, %arg3: memref<2x1xi32, #tpu.memory_space<smem>>, %arg4: memref<2x1xi32, #tpu.memory_space<smem>>) -> (i32, i32, i32) {
    %0 = arith.index_cast %arg0 : i32 to index
    %1 = arith.index_cast %arg1 : i32 to index
    %2 = memref.load %arg3[%0, %1] : memref<2x1xi32, #tpu.memory_space<smem>>
    %3 = arith.addi %2, %arg2 : i32
    %c1_i32 = arith.constant 1 : i32
    %4 = arith.minsi %3, %c1_i32 : i32
    %c0_i32 = arith.constant 0 : i32
    %c0_i32_0 = arith.constant 0 : i32
    return %arg0, %c0_i32, %4 : i32, i32, i32
  }
  func.func @transform_1(%arg0: i32, %arg1: i32, %arg2: i32, %arg3: memref<2x1xi32, #tpu.memory_space<smem>>, %arg4: memref<2x1xi32, #tpu.memory_space<smem>>) -> (i32, i32, i32) {
    %c0_i32 = arith.constant 0 : i32
    %c0_i32_0 = arith.constant 0 : i32
    return %arg0, %c0_i32, %arg1 : i32, i32, i32
  }
  func.func @transform_2(%arg0: i32, %arg1: i32, %arg2: i32, %arg3: memref<2x1xi32, #tpu.memory_space<smem>>, %arg4: memref<2x1xi32, #tpu.memory_space<smem>>) -> (i32, i32, i32) {
    %c0_i32 = arith.constant 0 : i32
    %c0_i32_0 = arith.constant 0 : i32
    return %arg0, %c0_i32, %arg1 : i32, i32, i32
  }
}

</mosaic_0001>

<bundles_post_ra>
// kernel: tpu_custom_call.1
= control target key start
LH: loop header
LB: loop body
LE: loop exit
PB: predicated region body
PF: predicated region fallthrough
CT: control target
= control target key end

     0   :  { %s2245_s0 = inlined_call_operand.vmem [shape: s32[2,1], index: 0, kind: input, shape index: {}]   ;;  %s2246_s2 = inlined_call_operand.hbm [shape: f32[2,4,256], index: 2, kind: input, shape index: {}]   ;;  %s2247_s3 = inlined_call_operand.vmem [shape: f32[2,2,256], index: 3, kind: input, shape index: {}]   ;;  %s2248_s4 = inlined_call_operand.hbm [shape: f32[2,4,256], index: 4, kind: output, shape index: {}]   ;;  %s2249_s1 = inlined_call_operand.vmem [shape: s32[2,1], index: 1, kind: input, shape index: {}]  }
   0x1   :  { %s9_s17 = sshll.u32 %s2245_s0, 4  ;;  %s13_s20 = sshll.u32 %s2249_s1, 4  ;;  %s10_s17 = int_to_ptr.vmem [resolvable:$true] %s9_s17  ;;  %s14_s20 = int_to_ptr.vmem [resolvable:$true] %s13_s20 }
   0x2   :  { %s1333_s21 = scalar_lea.vmem %s10_s17, 32  ;;  %p1338_p1 = scmp.lt.s32.totalorder %s10_s17, %s10_s17 }
   0x3   :  { %p1334_p0 = scmp.ne.s32.totalorder %s10_s17, %s1333_s21  ;;  %p1339_p2 = scmp.lt.s32.totalorder %s1333_s21, %s1333_s21 }
   0x5   :  { %p1340_p3 = por %p1339_p2, %p1338_p1 }
   0x7   :  { %p1341_p4 = pnand %p1340_p3, %p1334_p0 }
   0x9   :  { %1344 = shalt.err (!%p1341_p4)  }
   0xa   :  { %s1513_s22 = smov [#allocation5]   ;;  %s1345_s23 = scalar_lea.vmem %s14_s20, 32 }
   0xb   :  { %12 = dma.vmem_to_smem %s10_s17, 32, %s1513_s22, [#allocation4] }
   0xc   :  { %p1346_p5 = scmp.ne.s32.totalorder %s14_s20, %s1345_s23  ;;  %p1350_p6 = scmp.lt.s32.totalorder %s14_s20, %s14_s20 }
   0xd   :  { %p1351_p7 = scmp.lt.s32.totalorder %s1345_s23, %s1345_s23 }
   0xf   :  { %p1352_p8 = por %p1351_p7, %p1350_p6 }
  0x11   :  { %p1353_p9 = pnand %p1352_p8, %p1346_p5 }
  0x13   :  { %1356 = shalt.err (!%p1353_p9)  }
  0x14   :  { %s1514_s0 = smov [#allocation6]  }
  0x15   :  { %16 = dma.vmem_to_smem %s14_s20, 32, %s1514_s0, [#allocation4] }
  0x16   :  { %1459 = dma.done.wait [#allocation4], 64 }
  0x17   :  { %1460 = vsyncadd [#allocation4], 4294967232 }
  0x18   :  { %18 = sfence }
  0x19   :  { %19 = vsyncpa [#allocation8], 0 }
  0x1a   :  { %21 = vsyncpa [#allocation8 + $0x1], 0 }
  0x1b   :  { %22 = vsyncpa [#allocation9], 0 }
  0x1c   :  { %24 = vsyncpa [#allocation9 + $0x1], 0  ;;  %s1552_s1 = smov 0   ;;  %s1554_s24 = smov 0  }
  0x1d   :  { %s1556_s25 = smov 0   ;;  %s1558_s26 = smov 0  }
  0x1e   :  { %s1560_s27 = smov 0   ;;  %s1562_s28 = smov 0  }
  0x1f   :  { %s1564_s29 = smov 0   ;;  %s1566_s30 = smov 0  }
  0x20   :  { %s1568_s5 = smov 0   ;;  %s1570_s6 = smov 0  }
  0x21   :  { %s1572_s7 = smov 0  }
  0x22 LB: > { %2255 = sst [smem:[#allocation16_spill]] %s1491_s28  ;;  %s42_s8 = sadd.s32 1, %s1503_s5  ;;  %s1511_s7 = sphi %s1572_s7, %s30_s7   ;;  %s1507_s6 = sphi %s1570_s6, %s2293_s6   ;;  %s1503_s5 = sphi %s1568_s5, %s2292_s5   ;;  %s1499_s30 = sphi %s1566_s30, %s2291_s30   ;;  %s1495_s29 = sphi %s1564_s29, %s2290_s29   ;;  %s1491_s28 = sphi %s1562_s28, %s2282_s28   ;;  %s1487_s27 = sphi %s1560_s27, %s2289_s27   ;;  %s1483_s26 = sphi %s1558_s26, %s2288_s26   ;;  %s1479_s25 = sphi %s1556_s25, %s2287_s25   ;;  %s1475_s24 = sphi %s1554_s24, %s2286_s24   ;;  %s1471_s1 = sphi %s1552_s1, %s2285_s1  }
  0x23   : > { %s49_s9 = sadd.s32 1, %s1507_s6  ;;  %p43_p10 = scmp.ge.s32.totalorder %s42_s8, 2 }
  0x24   : > { %s1151_s10 = sshll.u32 %s1507_s6, 7  ;;  %s1149_s11 = sadd.s32 4294967295, %s1511_s7  }
  0x25   : > { %s60_s12 = sld [smem:[#allocation5 + %s1151_s10]]  ;;  %s2295_s8 = smov (%p43_p10, %s42_s8), 0 }
  0x26   : > { %2256 = sst [smem:[#allocation17_spill]] %s2295_s8  ;;  %s2297_s9 = smov (!%p43_p10, %s49_s9), %s1507_s6 }
  0x27   : > { %s1150_s13 = sadd.s32 4294967294, %s1511_s7   ;;  %p87_p11 = scmp.ne.s32.totalorder %s1491_s28, %s1487_s27 }
  0x28   : > { %p51_p12 = scmp.ge.s32.totalorder %s2297_s9, 2  ;;  %p93_p13 = scmp.ne.s32.totalorder %s1487_s27, %s1483_s26 }
  0x29   : > { %p88_p0 = scmp.eq.s32.totalorder %s1511_s7, 0  ;;  %p94_p1 = scmp.eq.s32.totalorder %s1149_s11, 0 }
  0x2a   : > { %s2299_s9 = smov (%p51_p12, %s2297_s9), 0  ;;  %s136_s19 = sadd.s32 1, %s1479_s25 }
  0x2b   : > { %2257 = sst [smem:[#allocation18_spill]] %s2299_s9  ;;  %s61_s14 = sadd.s32 %s1503_s5, %s60_s12 }
  0x2c   : > { %p1622_p2 = por %p94_p1, %p93_p13  ;;  %p62_p3 = scmp.lt.s32.totalorder %s61_s14, 1 }
  0x2d   : > { %s1152_s16 = sshll.u32 %s2299_s9, 7  ;;  %s75_s18 = ssub.s32 %s1507_s6, %s2299_s9 }
  0x2e   : > { %s2258_s15 = scalar_select %p1622_p2, 1, 0 }
  0x2f   : > { %s71_s17 = sld [smem:[#allocation5 + %s1152_s16]]  ;;  %s2301_s14 = smov (!%p62_p3, %s61_s14), 1 }
  0x30   : > { %p134_p4 = scmp.eq.s32.totalorder %s75_s18, 0  ;;  %p146_p5 = scmp.ne.s32.totalorder %s1479_s25, %s1475_s24 }
  0x31   : > { %p147_p6 = scmp.eq.s32.totalorder %s1149_s11, 3  ;;  %p152_p8 = scmp.ne.s32.totalorder %s1475_s24, %s1471_s1 }
  0x32   : > { %s1633_s20 = scalar_select %p134_p4, %s1479_s25, %s136_s19  }
  0x33   : > { %p1635_p7 = por %p147_p6, %p146_p5  ;;  %p153_p9 = scmp.eq.s32.totalorder %s1150_s13, 3 }
  0x34   : > { %p89_p13 = por %p88_p0, %p87_p11  ;;  %s80_s11 = sadd.s32 1, %s1491_s28 }
  0x35   : > { %s2259_s21 = scalar_select %p1635_p7, 1, 0 }
  0x36   : > { %s72_s22 = sadd.s32 %s71_s17, %s2295_s8  ;;  %p1642_p12 = por %p153_p9, %p152_p8 }
  0x37   : > { %p73_p10 = scmp.lt.s32.totalorder %s72_s22, 1  ;;  %p1237_p3 = scmp.lt.s32.totalorder %s1511_s7, 4 }
  0x38   : > { %s2260_s23 = scalar_select %p1642_p12, 1, 0 }
  0x39   : > { %s2303_s22 = smov (!%p73_p10, %s72_s22), 1  ;;  %s2305_s10 = smov (!%p89_p13, %s1151_s10), 0 }
  0x3a   : > { %s76_s0 = ssub.s32 %s2301_s14, %s2303_s22  ;;  %s2309_s10 = smov (!%p1237_p3, %s2305_s10), 0 }
  0x3b   : > { %s77_s26 = sor.u32 %s76_s0, %s75_s18  ;;  %s173_s16 = sand.u32 1, %s1491_s28  }
  0x3c   : > { %p78_p1 = scmp.eq.s32.totalorder %s77_s26, 0  ;;  %p1659_p4 = pnand %p1237_p3, %p89_p13 }
  0x3d   : > { %s1221_s12 = scalar_select %p89_p13, [#allocation5], [#allocation11] }
  0x3e   : > { %s1654_s13 = scalar_select %p78_p1, %s1491_s28, %s80_s11  }
  0x3f   : > { %s2307_s12 = smov (!%p1237_p3, %s1221_s12), [#allocation12]  ;;  %p1159_p11 = scmp.ge.s32.totalorder %s1511_s7, 1 }
  0x40   : > { %2261 = sst [smem:[#allocation19_spill]] %s1654_s13  ;;  %s1155_s14 = sshll.u32 %s173_s16, 2 }
  0x41   : > { %s185_s19 = sld [smem:[%s2307_s12 + %s2309_s10]]  ;;  %p215_p0 = scmp.lt.s32.totalorder %s1511_s7, 5 }
  0x42   : > { %s1157_s0 = sshll.u32 %s1507_s6, 1  ;;  %s177_s26 = scalar_lea.vmem [#allocation7], %s1155_s14 }
  0x43   : > { %p1665_p5 = pnand %p1159_p11, %p215_p0  ;;  %s197_s11 = sshll.u32 %s177_s26, 4  ;;  %s1671_s11 = int_to_ptr.vmem [resolvable:$true] %s197_s11 }
  0x44   : > { %s174_s28 = scalar_lea.sflag [#allocation8], %s173_s16  ;;  %p1359_p9 = pneg %p1659_p4 }
  0x47   : > { %s186_s22 = sadd.s32 %s1503_s5, %s185_s19 }
  0x48   : > { %p187_p6 = scmp.lt.s32.totalorder %s186_s22, 1 }
  0x4a   : > { %s2311_s22 = smov (!%p187_p6, %s186_s22), 1 }
  0x4b   : > { %s193_s9 = sadd.s32 %s1157_s0, %s2311_s22  ;;  %s1362_s22 = scalar_lea.hbm %s2246_s2, 256 }
  0x4c   : > { %s1158_s8 = sshll.u32 %s193_s9, 6 }
  0x4d   : > { %s1676_s13 = scalar_lea.hbm %s2246_s2, %s1158_s8 }
  0x4e   : > { %s1357_s19 = scalar_lea.hbm %s1676_s13, 64  ;;  %p1363_p1 = scmp.lt.u32.totalorder %s1676_s13, %s2246_s2 }
  0x4f   : > { %p1358_p8 = scmp.ne.s32.totalorder %s1676_s13, %s1357_s19  ;;  %p1364_p3 = scmp.lt.u32.totalorder %s1362_s22, %s1357_s19 }
  0x50   : > { %p1366_p0 = scmp.lt.u32.totalorder %s1357_s19, %s1676_s13 }
  0x51   : > { %p1360_p10 = pnand %p1359_p9, %p1358_p8  ;;  %p1365_p11 = por %p1364_p3, %p1363_p1 }
  0x53   : > { %p1361_p13 = pneg %p1360_p10  ;;  %p1367_p6 = por %p1366_p0, %p1365_p11 }
  0x55   : > { %p1368_p12 = pnand %p1367_p6, %p1361_p13 }
  0x57   : > { %1371 = shalt.err (!%p1368_p12)
}
  0x58   : > { %s1372_s16 = scalar_lea.vmem %s1671_s11, 64  ;;  %s1515_s26 = smov [#allocation7]  }
  0x59   : > { %p1373_p8 = scmp.ne.s32.totalorder %s1671_s11, %s1372_s16  ;;  %s1377_s10 = sshll.u32 %s1515_s26, 4  ;;  %s1378_s10 = int_to_ptr.vmem [resolvable:$false] %s1377_s10 }
  0x5a   : > { %s1379_s12 = scalar_lea.vmem %s1378_s10, 128  ;;  %p1380_p2 = scmp.lt.s32.totalorder %s1671_s11, %s1378_s10 }
  0x5b   : > { %p1375_p10 = pnand %p1373_p8, %p1359_p9  ;;  %p1381_p1 = scmp.lt.s32.totalorder %s1379_s12, %s1372_s16 }
  0x5d   : > { %p1376_p7 = pneg %p1375_p10  ;;  %p1382_p3 = por %p1381_p1, %p1380_p2 }
  0x5f   : > { %p1383_p11 = pnand %p1382_p3, %p1376_p7 }
  0x61   : > { %1386 = shalt.err (!%p1383_p11)
}
  0x62   : > { %1232 = dma.hbm_to_vmem [thread:$0]  (!%p1659_p4), %s1676_s13, 64, %s1671_s11, %s174_s28  }
  0x63   : > { %219 = sbr.rel (%p1665_p5) target bundleno = 522 (0x20a), region = 28  ;;  %s221_s19 = sand.u32 (!%p1665_p5), 1, %s1487_s27  }
  0x64   : > { %s1706_s14 = sshll.u32 (!%p1665_p5), %s221_s19, 2  ;;  %s222_s9 = scalar_lea.sflag (!%p1665_p5), [#allocation8], %s221_s19 }
  0x65   : > { %s225_s22 = scalar_lea.vmem (!%p1665_p5), [#allocation7], %s1706_s14  ;;  %p2264_p12 = scmp.ne.s32.totalorder (!%p1665_p5), %s2258_s15, 0 }
  0x6a   : > { %1462 = dma.done.wait (%p2264_p12), %s222_s9, 64  }
  0x6b   : > { %1464 = vsyncadd (%p2264_p12), %s222_s9, 4294967232  ;;  %s252_s28 = sand.u32 1, %s1475_s24   ;;  %p267_p2 = scmp.lt.s32.totalorder %s1499_s30, 1 }
  0x6c   : > { %s1161_s13 = sshll.u32 %s252_s28, 3  ;;  %p277_p7 = scmp.eq.s32.totalorder %s1495_s29, 0 }
  0x6d   : > { %s268_s17 = scalar_select %p267_p2, %s1499_s30, 1 }
  0x6e   : > { %s1722_s16 = scalar_lea.vmem [#allocation10], %s1161_s13  ;;  %p1164_p4 = scmp.ne.s32.totalorder %s1495_s29, 0 }
  0x6f   : > { %s1179_s18 = sshll.u32 %s268_s17, 2  ;;  %v317_v1 = vlaneseq (!%p1164_p4)  ;;  %v1516_v3 = vmov (!%p1164_p4), 1966171168   ;;  %v1517_v9 = vmov (!%p1164_p4), 0  }
  0x70   : > { %s274_s8 = scalar_lea.vmem %s2247_s3, %s1179_s18  ;;  %280 = sbr.rel (%p1164_p4) target bundleno = 136 (0x88), region = 36  ;;  %v315_v4 = vunpack.c.l.s4 (!%p1164_p4), %v1516_v3 }
  0x71   : > { %v281_v0 = vld [vmem:[%s274_s8] sm:$0xf] (!%p1164_p4)  ;;  %v318_v5 = vshrl.u32 (!%p1164_p4), %v317_v1, 7  ;;  %vm1762_vm11 = vcmp.lt.s32.totalorder (!%p1164_p4), %v317_v1, 256 }
  0x72   : > { %v282_v2 = vfloor.f32 (!%p1164_p4), %v281_v0  ;;  %v316_v7 = vunpack.c.0.s8 (!%p1164_p4), %v315_v4 }
  0x74   : > { %v305_v6 = vmax.f32 (!%p1164_p4), %v282_v2, 0.0  ;;  %v283_v8 = vsub.f32 (!%p1164_p4), %v281_v0, %v282_v2  ;;  %vm291_vm0 = vcmp.ge.f32.partialorder (!%p1164_p4), %v282_v2, 0.0  ;;  %vm292_vm1 = vcmp.le.f32.partialorder (!%p1164_p4), %v282_v2, 15.0 }
  0x75   : > { %v294_v10 = vsel (!%p1164_p4), %vm291_vm0, 1, %v1517_v9  ;;  %v336_v11 = vadd.f32 (!%p1164_p4), 1.0, %v282_v2  ;;  %v1727_v13 = vsub.s32 (!%p1164_p4), %v316_v7, %v318_v5  ;;  %vm1729_vm2 = vmand (!%p1164_p4), %vm291_vm0, %vm292_vm1  ;;  %v299_v17 = vsel (!%p1164_p4), %vm292_vm1, 1, %v1517_v9 }
  0x76   : > { %v306_v12 = vmin.f32 (!%p1164_p4), %v305_v6, 15.0  ;;  %v285_v14 = vsub.f32 (!%p1164_p4), 1.0, %v283_v8  ;;  %v1165_v16 = vrot.slane (!%p1164_p4), %v294_v10, 9  ;;  %v338_v19 = vrot.slane (!%p1164_p4), %v283_v8, 7 }
  0x77   : > { %v355_v18 = vmax.f32 %v336_v11, 0.0  ;;  %vm342_vm3 = vcmp.ge.f32.partialorder %v336_v11, 0.0  ;;  %v1166_v24 = vrot.slane %v299_v17, 9  ;;  %vm348_vm6 = vcmp.le.f32.partialorder %v336_v11, 15.0 }
  0x78   : > { %v307_v20 = vmul.f32 16.0, %v306_v12  ;;  %v309_v21 = vrot.slane %v306_v12, 7  ;;  %v287_v22 = vrot.slane %v285_v14, 7  ;;  %vm1733_vm4 = vcmp.ne.s32.totalorder %v1165_v16, 0  ;;  %vm1747_vm8 = vmand %vm342_vm3, %vm348_vm6 }
  0x79   : > { %vm298_vm5 = vmand %vm1729_vm2, %vm1733_vm4  ;;  %v356_v25 = vmin.f32 %v355_v18, 15.0  ;;  %v339_v26 = vrot.slane %v338_v19, 2  ;;  %v343_v27 = vsel %vm342_vm3, 1, %v1517_v9  ;;  %vm1742_vm7 = vcmp.ne.s32.totalorder %v1166_v24, 0 }
  0x7a   : > { %v310_v28 = vrot.slane %v309_v21, 2  ;;  %v288_v29 = vrot.slane %v287_v22, 2  ;;  %v1167_v30 = vrot.slane %v343_v27, 9  ;;  %v349_v34 = vsel %vm348_vm6, 1, %v1517_v9  ;;  %vm303_vm9 = vmand %vm298_vm5, %vm1742_vm7 }
  0x7b   : > { %v358_v32 = vrot.slane %v356_v25, 7  ;;  %v341_v33 = vmul.f32 %v339_v26, %v285_v14  ;;  %v1168_v39 = vrot.slane %v349_v34, 9  ;;  %v388_v42 = vmul.f32 16.0, %v356_v25  ;;  %vm385_vm14 = vmand %vm1747_vm8, %vm1733_vm4 }
  0x7c   : > { %v312_v36 = vadd.f32 %v310_v28, %v307_v20  ;;  %v290_v37 = vmul.f32 %v288_v29, %v285_v14  ;;  %vm1758_vm10 = vcmp.ne.s32.totalorder %v1167_v30, 0  ;;  %v383_v43 = vmul.f32 %v288_v29, %v283_v8  ;;  %vm386_vm0 = vmand %vm385_vm14, %vm1742_vm7 }
  0x7d   : > { %v359_v41 = vrot.slane %v358_v32, 2  ;;  %vm347_vm12 = vmand %vm1729_vm2, %vm1758_vm10  ;;  %vm1770_vm13 = vcmp.ne.s32.totalorder %v1168_v39, 0  ;;  %v411_v47 = vmul.f32 %v339_v26, %v283_v8  ;;  %v389_v50 = vadd.f32 %v388_v42, %v310_v28 }
  0x7e   : > { %v1213_v44 = vtrunc.f32 %v312_v36  ;;  %v304_v45 = vsel %vm303_vm9, %v290_v37, 0.0  ;;  %vm353_vm15 = vmand %vm347_vm12, %vm1770_vm13  ;;  %v387_v57 = vsel %vm386_vm0, %v383_v43, 0.0 }
  0x7f   : > { %v333_v48 = vrot.slane %v304_v45, %v1727_v13  ;;  %v361_v49 = vadd.f32 %v359_v41, %v307_v20  ;;  %v415_v51 = vadd.f32 %v388_v42, %v359_v41  ;;  %v354_v53 = vsel %vm353_vm15, %v341_v33, 0.0  ;;  %vm412_vm1 = vmand %vm1747_vm8, %vm1758_vm10 }
  0x80   : > { %v1214_v52 = vcvt.f32.s32 %v1213_v44  ;;  %v379_v55 = vrot.slane %v354_v53, %v1727_v13  ;;  %v1217_v56 = vtrunc.f32 %v389_v50  ;;  %v407_v59 = vrot.slane %v387_v57, %v1727_v13  ;;  %vm413_vm2 = vmand %vm412_vm1, %vm1770_vm13 }
  0x81   : > { %335 = vst.msk [vmem:[#allocation3] ss:$4 sm:$0x3] %vm1762_vm11, %v333_v48  ;;  %v1215_v54 = vtrunc.f32 %v361_v49  ;;  %v1219_v60 = vtrunc.f32 %v415_v51  ;;  %v414_v63 = vsel %vm413_vm2, %v411_v47, 0.0 }
  0x82   : > { %v320_v58 = vrot.slane %v1214_v52, %v1727_v13  ;;  %382 = vst.msk [vmem:[#allocation3 + $0x1] ss:$4 sm:$0x3] %vm1762_vm11, %v379_v55  ;;  %v1218_v62 = vcvt.f32.s32 %v1217_v56  ;;  %410 = vst.msk [vmem:[#allocation3 + $0x2] ss:$4 sm:$0x3] %vm1762_vm11, %v407_v59  ;;  %v433_v1 = vrot.slane %v414_v63, %v1727_v13 }
  0x83   : > { %v1216_v61 = vcvt.f32.s32 %v1215_v54  ;;  %v1220_v0 = vcvt.f32.s32 %v1219_v60 }
  0x84   : > { %325 = vst.msk [vmem:[#allocation2] ss:$4 sm:$0x3] %vm1762_vm11, %v320_v58  ;;  %v397_v3 = vrot.slane %v1218_v62, %v1727_v13  ;;  %436 = vst.msk [vmem:[#allocation3 + $0x3] ss:$4 sm:$0x3] %vm1762_vm11, %v433_v1 }
  0x85   : > { %v369_v2 = vrot.slane %v1216_v61, %v1727_v13  ;;  %v423_v4 = vrot.slane %v1220_v0, %v1727_v13 }
  0x86   : > { %399 = vst.msk [vmem:[#allocation2 + $0x2] ss:$4 sm:$0x3] %vm1762_vm11, %v397_v3 }
  0x87   : > { %371 = vst.msk [vmem:[#allocation2 + $0x1] ss:$4 sm:$0x3] %vm1762_vm11, %v369_v2  ;;  %425 = vst.msk [vmem:[#allocation2 + $0x3] ss:$4 sm:$0x3] %vm1762_vm11, %v423_v4 }
  0x88 PF: > { %s1813_s15 = sshll.u32 %s1499_s30, 7 }
  0x89   : > { %s1816_s26 = sld [smem:[#allocation6 + %s1813_s15]] }
  0x8f   : > { %p1170_p5 = scmp.ge.s32.totalorder %s1495_s29, %s1816_s26 }
  0x90   : > { %s449_s10 = sld [smem:[#allocation5 + %s1813_s15]] (!%p1170_p5)  ;;  %v452_v5 = vlaneseq (!%p1170_p5)  ;;  %v486_v6 = vld [vmem:[#allocation2] ss:$4 sm:$0x3] (!%p1170_p5)  ;;  %v1518_v9 = vmov (!%p1170_p5), 0.0  }
  0x91   : > { %448 = sbr.rel (%p1170_p5) target bundleno = 488 (0x1e8), region = 40  ;;  %v527_v7 = vld [vmem:[#allocation3] ss:$4 sm:$0x3] (!%p1170_p5)  ;;  %993 = vmatprep.mubr.f32.mxu0 (!%p1170_p5), %v1518_v9 }
  0x92   : > { %v572_v8 = vld [vmem:[#allocation2 + $0x1] ss:$4 sm:$0x3] (!%p1170_p5)  ;;  %v1824_v10 = vshrl.u32 (!%p1170_p5), %v452_v5, 7 }
  0x93   : > { %v614_v11 = vld [vmem:[#allocation3 + $0x1] ss:$4 sm:$0x3] (!%p1170_p5)  ;;  %v691_v12 = vld [vmem:[#allocation2 + $0x2] ss:$4 sm:$0x3] (!%p1170_p5) }
  0x94   : > { %v733_v13 = vld [vmem:[#allocation3 + $0x2] ss:$4 sm:$0x3] (!%p1170_p5)  ;;  %v454_v14 = vadd.s32 (!%p1170_p5), 8, %v1824_v10  ;;  %v493_v15 = vsub.s32 (!%p1170_p5), 1, %v1824_v10  ;;  %v489_v17 = vsub.s32 (!%p1170_p5), 0, %v1824_v10 }
  0x95   : > { %v810_v16 = vld [vmem:[#allocation2 + $0x3] ss:$4 sm:$0x3] (!%p1170_p5)  ;;  %v852_v18 = vld [vmem:[#allocation3 + $0x3] ss:$4 sm:$0x3] (!%p1170_p5) }
  0x96   : > { %v455_v19 = vadd.s32 (!%p1170_p5), 16, %v1824_v10  ;;  %v1831_v20 = vadd.s32 (!%p1170_p5), 24, %v1824_v10  ;;  %v1834_v21 = vadd.s32 (!%p1170_p5), 32, %v1824_v10  ;;  %s450_s30 = sadd.s32 (!%p1170_p5), %s1495_s29, %s449_s10  ;;  %v1837_v22 = vrot.slane (!%p1170_p5), %v486_v6, %v493_v15 }
  0x97   : > { %v1839_v23 = vrot.slane (!%p1170_p5), %v527_v7, %v493_v15  ;;  %v1841_v24 = vrot.slane (!%p1170_p5), %v572_v8, %v493_v15  ;;  %v1843_v25 = vrot.slane (!%p1170_p5), %v614_v11, %v493_v15  ;;  %s1171_s12 = sshll.u32 (!%p1170_p5), %s450_s30, 7  ;;  %v1845_v26 = vrot.slane (!%p1170_p5), %v691_v12, %v493_v15 }
  0x98   : > { %v1847_v27 = vrot.slane %v733_v13, %v493_v15  ;;  %v1849_v28 = vrot.slane %v810_v16, %v493_v15  ;;  %v1851_v29 = vrot.slane %v852_v18, %v493_v15  ;;  %v1853_v30 = vstv %s1171_s12 }
  0x99   : > { %v1855_v31 = vrot.slane %v486_v6, %v489_v17  ;;  %v1857_v32 = vrot.slane %v527_v7, %v489_v17  ;;  %v1859_v33 = vrot.slane %v572_v8, %v489_v17  ;;  %v470_v34 = vadd.s32 %v1853_v30, %v1824_v10 }
  0x9a   : > { %v471_v35 = vadd.s32 %v1853_v30, %v454_v14  ;;  %v1864_v36 = vrot.slane %v614_v11, %v489_v17  ;;  %v1866_v37 = vrot.slane %v691_v12, %v489_v17  ;;  %v1868_v38 = vrot.slane %v733_v13, %v489_v17 }
  0x9b   : > { %v1870_v39 = vrot.slane %v810_v16, %v489_v17  ;;  %v1872_v40 = vrot.slane %v852_v18, %v489_v17  ;;  %v1875_v41 = vadd.s32 %v1853_v30, %v455_v19  ;;  %vm496_vm3 = vcmp.eq.s32.totalorder %v470_v34, %v1837_v22 }
  0x9c   : > { %vm498_vm4 = vcmp.eq.s32.totalorder %v471_v35, %v1837_v22  ;;  %vm582_vm5 = vcmp.eq.s32.totalorder %v470_v34, %v1841_v24  ;;  %vm584_vm6 = vcmp.eq.s32.totalorder %v471_v35, %v1841_v24  ;;  %v540_v42 = vsel %vm496_vm3, %v1839_v23, 0.0 }
  0x9d   : > { %v542_v43 = vsel %vm498_vm4, %v1839_v23, 0.0  ;;  %v627_v44 = vsel %vm582_vm5, %v1843_v25, 0.0  ;;  %v629_v45 = vsel %vm584_vm6, %v1843_v25, 0.0  ;;  %vm701_vm7 = vcmp.eq.s32.totalorder %v470_v34, %v1845_v26 }
  0x9e   : > { %v659_v46 = vadd.f32 %v627_v44, %v540_v42  ;;  %v661_v47 = vadd.f32 %v629_v45, %v542_v43  ;;  %vm703_vm8 = vcmp.eq.s32.totalorder %v471_v35, %v1845_v26  ;;  %v746_v48 = vsel %vm701_vm7, %v1847_v27, 0.0 }
  0x9f   : > { %v748_v49 = vsel %vm703_vm8, %v1847_v27, 0.0  ;;  %vm820_vm9 = vcmp.eq.s32.totalorder %v470_v34, %v1849_v28  ;;  %vm822_vm10 = vcmp.eq.s32.totalorder %v471_v35, %v1849_v28  ;;  %vm495_vm11 = vcmp.eq.s32.totalorder %v470_v34, %v1855_v31 }
  0xa0   : > { %v778_v50 = vadd.f32 %v746_v48, %v659_v46  ;;  %v780_v51 = vadd.f32 %v748_v49, %v661_v47  ;;  %v865_v52 = vsel %vm820_vm9, %v1851_v29, 0.0  ;;  %v867_v53 = vsel %vm822_vm10, %v1851_v29, 0.0 }
  0xa1   : > { %vm497_vm12 = vcmp.eq.s32.totalorder %v471_v35, %v1855_v31  ;;  %vm581_vm13 = vcmp.eq.s32.totalorder %v470_v34, %v1859_v33  ;;  %vm583_vm14 = vcmp.eq.s32.totalorder %v471_v35, %v1859_v33  ;;  %v539_v56 = vsel %vm495_vm11, %v1857_v32, 0.0 }
  0xa2   : > { %v897_v54 = vadd.f32 %v865_v52, %v778_v50  ;;  %v899_v55 = vadd.f32 %v867_v53, %v780_v51  ;;  %v541_v57 = vsel %vm497_vm12, %v1857_v32, 0.0  ;;  %v626_v58 = vsel %vm581_vm13, %v1864_v36, 0.0 }
  0xa3   : > { %v628_v59 = vsel %vm583_vm14, %v1864_v36, 0.0  ;;  %vm700_vm15 = vcmp.eq.s32.totalorder %v470_v34, %v1866_v37  ;;  %vm702_vm0 = vcmp.eq.s32.totalorder %v471_v35, %v1866_v37  ;;  %v658_v61 = vadd.f32 %v626_v58, %v539_v56 }
  0xa4   : > { %v1181_v60 = vpack.c.bf16 %v899_v55, %v897_v54  ;;  %v660_v62 = vadd.f32 %v628_v59, %v541_v57  ;;  %v745_v63 = vsel %vm700_vm15, %v1868_v38, 0.0  ;;  %v747_v0 = vsel %vm702_vm0, %v1868_v38, 0.0 }
  0xa5   : > { %vm819_vm1 = vcmp.eq.s32.totalorder %v470_v34, %v1870_v39  ;;  %vm821_vm2 = vcmp.eq.s32.totalorder %v471_v35, %v1870_v39  ;;  %v473_v1 = vadd.s32 %v1853_v30, %v1831_v20  ;;  %v777_v2 = vadd.f32 %v745_v63, %v658_v61 }
  0xa6   : > { %1182 = vmatprep.subr.bf16.mxu0 %v1181_v60  ;;  %v779_v3 = vadd.f32 %v747_v0, %v660_v62  ;;  %v864_v4 = vsel %vm819_vm1, %v1872_v40, 0.0  ;;  %v866_v5 = vsel %vm821_vm2, %v1872_v40, 0.0  ;;  %vm500_vm3 = vcmp.eq.s32.totalorder %v1875_v41, %v1837_v22 }
  0xa7   : > { %vm502_vm4 = vcmp.eq.s32.totalorder %v473_v1, %v1837_v22  ;;  %vm586_vm5 = vcmp.eq.s32.totalorder %v1875_v41, %v1841_v24  ;;  %vm588_vm6 = vcmp.eq.s32.totalorder %v473_v1, %v1841_v24  ;;  %v896_v6 = vadd.f32 %v864_v4, %v777_v2 }
  0xa8   : > { %v898_v7 = vadd.f32 %v866_v5, %v779_v3  ;;  %v544_v8 = vsel %vm500_vm3, %v1839_v23, 0.0  ;;  %v546_v9 = vsel %vm502_vm4, %v1839_v23, 0.0  ;;  %v631_v11 = vsel %vm586_vm5, %v1843_v25, 0.0 }
  0xa9   : > { %v633_v12 = vsel %vm588_vm6, %v1843_v25, 0.0  ;;  %vm705_vm7 = vcmp.eq.s32.totalorder %v1875_v41, %v1845_v26  ;;  %vm707_vm8 = vcmp.eq.s32.totalorder %v473_v1, %v1845_v26  ;;  %v663_v14 = vadd.f32 %v631_v11, %v544_v8 }
  0xaa   : > { %v1183_v13 = vpack.c.bf16 %v898_v7, %v896_v6  ;;  %v665_v15 = vadd.f32 %v633_v12, %v546_v9  ;;  %v750_v16 = vsel %vm705_vm7, %v1847_v27, 0.0  ;;  %v752_v17 = vsel %vm707_vm8, %v1847_v27, 0.0 }
  0xab   : > { %vm824_vm9 = vcmp.eq.s32.totalorder %v1875_v41, %v1849_v28  ;;  %vm826_vm10 = vcmp.eq.s32.totalorder %v473_v1, %v1849_v28  ;;  %vm499_vm11 = vcmp.eq.s32.totalorder %v1875_v41, %v1855_v31  ;;  %v782_v18 = vadd.f32 %v750_v16, %v663_v14 }
  0xac   : > { %1184 = vmatpush1.bf16.msra.mxu0 %v1183_v13  ;;  %v784_v19 = vadd.f32 %v752_v17, %v665_v15  ;;  %v869_v20 = vsel %vm824_vm9, %v1851_v29, 0.0  ;;  %v871_v34 = vsel %vm826_vm10, %v1851_v29, 0.0  ;;  %vm501_vm12 = vcmp.eq.s32.totalorder %v473_v1, %v1855_v31 }
  0xad   : > { %v543_v35 = vsel %vm499_vm11, %v1857_v32, 0.0  ;;  %vm585_vm13 = vcmp.eq.s32.totalorder %v1875_v41, %v1859_v33  ;;  %vm587_vm14 = vcmp.eq.s32.totalorder %v473_v1, %v1859_v33  ;;  %v901_v42 = vadd.f32 %v869_v20, %v782_v18 }
  0xae   : > { %v903_v43 = vadd.f32 %v871_v34, %v784_v19  ;;  %v545_v44 = vsel %vm501_vm12, %v1857_v32, 0.0  ;;  %v630_v45 = vsel %vm585_vm13, %v1864_v36, 0.0  ;;  %v632_v46 = vsel %vm587_vm14, %v1864_v36, 0.0 }
  0xaf   : > { %v662_v47 = vadd.f32 %v630_v45, %v543_v35  ;;  %vm704_vm15 = vcmp.eq.s32.totalorder %v1875_v41, %v1866_v37  ;;  %vm706_vm0 = vcmp.eq.s32.totalorder %v473_v1, %v1866_v37  ;;  %v664_v49 = vadd.f32 %v632_v46, %v545_v44 }
  0xb0   : > { %v1185_v48 = vpack.c.bf16 %v903_v43, %v901_v42  ;;  %v749_v50 = vsel %vm704_vm15, %v1868_v38, 0.0  ;;  %v751_v51 = vsel %vm706_vm0, %v1868_v38, 0.0  ;;  %vm823_vm1 = vcmp.eq.s32.totalorder %v1875_v41, %v1870_v39 }
  0xb1   : > { %v781_v52 = vadd.f32 %v749_v50, %v662_v47  ;;  %vm825_vm2 = vcmp.eq.s32.totalorder %v473_v1, %v1870_v39  ;;  %v458_v53 = vadd.s32 40, %v1824_v10  ;;  %v783_v54 = vadd.f32 %v751_v51, %v664_v49 }
  0xb2   : > { %1186 = vmatprep.subr.bf16.mxu0 %v1185_v48  ;;  %v868_v55 = vsel %vm823_vm1, %v1872_v40, 0.0  ;;  %v870_v56 = vsel %vm825_vm2, %v1872_v40, 0.0  ;;  %v474_v57 = vadd.s32 %v1853_v30, %v1834_v21  ;;  %v459_v60 = vadd.s32 48, %v1824_v10 }
  0xb3   : > { %v900_v58 = vadd.f32 %v868_v55, %v781_v52  ;;  %v475_v59 = vadd.s32 %v1853_v30, %v458_v53  ;;  %v460_v41 = vadd.s32 56, %v1824_v10  ;;  %v902_v61 = vadd.f32 %v870_v56, %v783_v54 }
  0xb4   : > { %vm504_vm3 = vcmp.eq.s32.totalorder %v474_v57, %v1837_v22  ;;  %vm590_vm4 = vcmp.eq.s32.totalorder %v474_v57, %v1841_v24  ;;  %vm709_vm5 = vcmp.eq.s32.totalorder %v474_v57, %v1845_v26  ;;  %vm828_vm9 = vcmp.eq.s32.totalorder %v474_v57, %v1849_v28 }
  0xb5   : > { %vm506_vm6 = vcmp.eq.s32.totalorder %v475_v59, %v1837_v22  ;;  %v548_v62 = vsel %vm504_vm3, %v1839_v23, 0.0  ;;  %vm592_vm7 = vcmp.eq.s32.totalorder %v475_v59, %v1841_v24  ;;  %v635_v21 = vsel %vm590_vm4, %v1843_v25, 0.0 }
  0xb6   : > { %v1187_v63 = vpack.c.bf16 %v902_v61, %v900_v58  ;;  %v550_v0 = vsel %vm506_vm6, %v1839_v23, 0.0  ;;  %v637_v1 = vsel %vm592_vm7, %v1843_v25, 0.0  ;;  %v667_v2 = vadd.f32 %v635_v21, %v548_v62 }
  0xb7   : > { %v669_v3 = vadd.f32 %v637_v1, %v550_v0  ;;  %vm711_vm8 = vcmp.eq.s32.totalorder %v475_v59, %v1845_v26  ;;  %v754_v4 = vsel %vm709_vm5, %v1847_v27, 0.0  ;;  %vm830_vm10 = vcmp.eq.s32.totalorder %v475_v59, %v1849_v28 }
  0xb8   : > { %1188 = vmatpush1.bf16.msra.mxu0 %v1187_v63  ;;  %v756_v5 = vsel %vm711_vm8, %v1847_v27, 0.0  ;;  %v786_v6 = vadd.f32 %v754_v4, %v667_v2  ;;  %v873_v7 = vsel %vm828_vm9, %v1851_v29, 0.0  ;;  %v875_v9 = vsel %vm830_vm10, %v1851_v29, 0.0 }
  0xb9   : > { %v788_v8 = vadd.f32 %v756_v5, %v669_v3  ;;  %vm503_vm11 = vcmp.eq.s32.totalorder %v474_v57, %v1855_v31  ;;  %vm505_vm12 = vcmp.eq.s32.totalorder %v475_v59, %v1855_v31  ;;  %vm589_vm13 = vcmp.eq.s32.totalorder %v474_v57, %v1859_v33 }
  0xba   : > { %v905_v11 = vadd.f32 %v873_v7, %v786_v6  ;;  %v547_v12 = vsel %vm503_vm11, %v1857_v32, 0.0  ;;  %v549_v13 = vsel %vm505_vm12, %v1857_v32, 0.0  ;;  %vm591_vm14 = vcmp.eq.s32.totalorder %v475_v59, %v1859_v33 }
  0xbb   : > { %v907_v14 = vadd.f32 %v875_v9, %v788_v8  ;;  %v634_v15 = vsel %vm589_vm13, %v1864_v36, 0.0  ;;  %vm708_vm15 = vcmp.eq.s32.totalorder %v474_v57, %v1866_v37  ;;  %v636_v16 = vsel %vm591_vm14, %v1864_v36, 0.0 }
  0xbc   : > { %v666_v17 = vadd.f32 %v634_v15, %v547_v12  ;;  %vm710_vm0 = vcmp.eq.s32.totalorder %v475_v59, %v1866_v37  ;;  %v753_v18 = vsel %vm708_vm15, %v1868_v38, 0.0  ;;  %v668_v20 = vadd.f32 %v636_v16, %v549_v13 }
  0xbd   : > { %v1189_v19 = vpack.c.bf16 %v907_v14, %v905_v11  ;;  %v755_v34 = vsel %vm710_vm0, %v1868_v38, 0.0  ;;  %vm827_vm1 = vcmp.eq.s32.totalorder %v474_v57, %v1870_v39  ;;  %vm829_vm2 = vcmp.eq.s32.totalorder %v475_v59, %v1870_v39 }
  0xbe   : > { %v785_v35 = vadd.f32 %v753_v18, %v666_v17  ;;  %v872_v42 = vsel %vm827_vm1, %v1872_v40, 0.0  ;;  %v476_v43 = vadd.s32 %v1853_v30, %v459_v60  ;;  %v787_v44 = vadd.f32 %v755_v34, %v668_v20 }
  0xbf   : > { %1190 = vmatprep.subr.bf16.mxu0 %v1189_v19  ;;  %v874_v45 = vsel %vm829_vm2, %v1872_v40, 0.0  ;;  %v477_v46 = vadd.s32 %v1853_v30, %v460_v41  ;;  %v461_v47 = vadd.s32 64, %v1824_v10  ;;  %v462_v9 = vadd.s32 72, %v1824_v10 }
  0xc0   : > { %v904_v48 = vadd.f32 %v872_v42, %v785_v35  ;;  %vm508_vm3 = vcmp.eq.s32.totalorder %v476_v43, %v1837_v22  ;;  %vm594_vm4 = vcmp.eq.s32.totalorder %v476_v43, %v1841_v24  ;;  %vm713_vm5 = vcmp.eq.s32.totalorder %v476_v43, %v1845_v26 }
  0xc1   : > { %v906_v49 = vadd.f32 %v874_v45, %v787_v44  ;;  %vm510_vm6 = vcmp.eq.s32.totalorder %v477_v46, %v1837_v22  ;;  %v552_v50 = vsel %vm508_vm3, %v1839_v23, 0.0  ;;  %vm596_vm7 = vcmp.eq.s32.totalorder %v477_v46, %v1841_v24 }
  0xc2   : > { %v554_v51 = vsel %vm510_vm6, %v1839_v23, 0.0  ;;  %v639_v52 = vsel %vm594_vm4, %v1843_v25, 0.0  ;;  %v641_v53 = vsel %vm596_vm7, %v1843_v25, 0.0  ;;  %vm715_vm8 = vcmp.eq.s32.totalorder %v477_v46, %v1845_v26 }
  0xc3   : > { %v1191_v54 = vpack.c.bf16 %v906_v49, %v904_v48  ;;  %v671_v55 = vadd.f32 %v639_v52, %v552_v50  ;;  %v673_v56 = vadd.f32 %v641_v53, %v554_v51  ;;  %v758_v57 = vsel %vm713_vm5, %v1847_v27, 0.0 }
  0xc4   : > { %v760_v58 = vsel %vm715_vm8, %v1847_v27, 0.0  ;;  %vm832_vm9 = vcmp.eq.s32.totalorder %v476_v43, %v1849_v28  ;;  %vm834_vm10 = vcmp.eq.s32.totalorder %v477_v46, %v1849_v28  ;;  %vm507_vm11 = vcmp.eq.s32.totalorder %v476_v43, %v1855_v31 }
  0xc5   : > { %1192 = vmatpush1.bf16.msra.mxu0 %v1191_v54  ;;  %v790_v59 = vadd.f32 %v758_v57, %v671_v55  ;;  %v792_v60 = vadd.f32 %v760_v58, %v673_v56  ;;  %v877_v41 = vsel %vm832_vm9, %v1851_v29, 0.0  ;;  %v879_v61 = vsel %vm834_vm10, %v1851_v29, 0.0 }
  0xc6   : > { %vm509_vm12 = vcmp.eq.s32.totalorder %v477_v46, %v1855_v31  ;;  %v551_v62 = vsel %vm507_vm11, %v1857_v32, 0.0  ;;  %vm593_vm13 = vcmp.eq.s32.totalorder %v476_v43, %v1859_v33  ;;  %vm595_vm14 = vcmp.eq.s32.totalorder %v477_v46, %v1859_v33 }
  0xc7   : > { %v909_v21 = vadd.f32 %v877_v41, %v790_v59  ;;  %v911_v63 = vadd.f32 %v879_v61, %v792_v60  ;;  %v553_v0 = vsel %vm509_vm12, %v1857_v32, 0.0  ;;  %v638_v1 = vsel %vm593_vm13, %v1864_v36, 0.0 }
  0xc8   : > { %v640_v2 = vsel %vm595_vm14, %v1864_v36, 0.0  ;;  %v670_v3 = vadd.f32 %v638_v1, %v551_v62  ;;  %vm712_vm15 = vcmp.eq.s32.totalorder %v476_v43, %v1866_v37  ;;  %vm714_vm0 = vcmp.eq.s32.totalorder %v477_v46, %v1866_v37 }
  0xc9   : > { %v1193_v4 = vpack.c.bf16 %v911_v63, %v909_v21  ;;  %v672_v5 = vadd.f32 %v640_v2, %v553_v0  ;;  %v757_v6 = vsel %vm712_vm15, %v1868_v38, 0.0  ;;  %v759_v7 = vsel %vm714_vm0, %v1868_v38, 0.0 }
  0xca   : > { %v789_v8 = vadd.f32 %v757_v6, %v670_v3  ;;  %vm831_vm1 = vcmp.eq.s32.totalorder %v476_v43, %v1870_v39  ;;  %vm833_vm2 = vcmp.eq.s32.totalorder %v477_v46, %v1870_v39  ;;  %v478_v14 = vadd.s32 %v1853_v30, %v461_v47 }
  0xcb   : > { %1194 = vmatprep.subr.bf16.mxu0 %v1193_v4  ;;  %v791_v11 = vadd.f32 %v759_v7, %v672_v5  ;;  %v876_v12 = vsel %vm831_vm1, %v1872_v40, 0.0  ;;  %v878_v13 = vsel %vm833_vm2, %v1872_v40, 0.0  ;;  %v479_v16 = vadd.s32 %v1853_v30, %v462_v9 }
  0xcc   : > { %v908_v15 = vadd.f32 %v876_v12, %v789_v8  ;;  %v463_v17 = vadd.s32 80, %v1824_v10  ;;  %v464_v18 = vadd.s32 88, %v1824_v10  ;;  %vm512_vm3 = vcmp.eq.s32.totalorder %v478_v14, %v1837_v22 }
  0xcd   : > { %v910_v19 = vadd.f32 %v878_v13, %v791_v11  ;;  %vm598_vm4 = vcmp.eq.s32.totalorder %v478_v14, %v1841_v24  ;;  %vm717_vm5 = vcmp.eq.s32.totalorder %v478_v14, %v1845_v26  ;;  %vm514_vm6 = vcmp.eq.s32.totalorder %v479_v16, %v1837_v22 }
  0xce   : > { %v556_v20 = vsel %vm512_vm3, %v1839_v23, 0.0  ;;  %vm600_vm7 = vcmp.eq.s32.totalorder %v479_v16, %v1841_v24  ;;  %v643_v34 = vsel %vm598_vm4, %v1843_v25, 0.0  ;;  %v558_v42 = vsel %vm514_vm6, %v1839_v23, 0.0 }
  0xcf   : > { %v1195_v35 = vpack.c.bf16 %v910_v19, %v908_v15  ;;  %v645_v43 = vsel %vm600_vm7, %v1843_v25, 0.0  ;;  %v675_v44 = vadd.f32 %v643_v34, %v556_v20  ;;  %vm719_vm8 = vcmp.eq.s32.totalorder %v479_v16, %v1845_v26 }
  0xd0   : > { %v677_v45 = vadd.f32 %v645_v43, %v558_v42  ;;  %v762_v46 = vsel %vm717_vm5, %v1847_v27, 0.0  ;;  %vm836_vm9 = vcmp.eq.s32.totalorder %v478_v14, %v1849_v28  ;;  %v764_v47 = vsel %vm719_vm8, %v1847_v27, 0.0 }
  0xd1   : > { %1196 = vmatpush1.bf16.msra.mxu0 %v1195_v35  ;;  %v794_v48 = vadd.f32 %v762_v46, %v675_v44  ;;  %vm838_vm10 = vcmp.eq.s32.totalorder %v479_v16, %v1849_v28  ;;  %v881_v49 = vsel %vm836_vm9, %v1851_v29, 0.0  ;;  %vm511_vm11 = vcmp.eq.s32.totalorder %v478_v14, %v1855_v31 }
  0xd2   : > { %v796_v50 = vadd.f32 %v764_v47, %v677_v45  ;;  %v883_v51 = vsel %vm838_vm10, %v1851_v29, 0.0  ;;  %vm513_vm12 = vcmp.eq.s32.totalorder %v479_v16, %v1855_v31  ;;  %v555_v53 = vsel %vm511_vm11, %v1857_v32, 0.0 }
  0xd3   : > { %v913_v52 = vadd.f32 %v881_v49, %v794_v48  ;;  %v557_v54 = vsel %vm513_vm12, %v1857_v32, 0.0  ;;  %vm597_vm13 = vcmp.eq.s32.totalorder %v478_v14, %v1859_v33  ;;  %vm599_vm14 = vcmp.eq.s32.totalorder %v479_v16, %v1859_v33 }
  0xd4   : > { %v915_v55 = vadd.f32 %v883_v51, %v796_v50  ;;  %v642_v56 = vsel %vm597_vm13, %v1864_v36, 0.0  ;;  %vm716_vm15 = vcmp.eq.s32.totalorder %v478_v14, %v1866_v37  ;;  %v644_v57 = vsel %vm599_vm14, %v1864_v36, 0.0 }
  0xd5   : > { %v674_v58 = vadd.f32 %v642_v56, %v555_v53  ;;  %vm718_vm0 = vcmp.eq.s32.totalorder %v479_v16, %v1866_v37  ;;  %v761_v59 = vsel %vm716_vm15, %v1868_v38, 0.0  ;;  %v676_v41 = vadd.f32 %v644_v57, %v557_v54 }
  0xd6   : > { %v1197_v60 = vpack.c.bf16 %v915_v55, %v913_v52  ;;  %v763_v61 = vsel %vm718_vm0, %v1868_v38, 0.0  ;;  %vm835_vm1 = vcmp.eq.s32.totalorder %v478_v14, %v1870_v39  ;;  %vm837_vm2 = vcmp.eq.s32.totalorder %v479_v16, %v1870_v39 }
  0xd7   : > { %v793_v62 = vadd.f32 %v761_v59, %v674_v58  ;;  %v880_v21 = vsel %vm835_vm1, %v1872_v40, 0.0  ;;  %v480_v63 = vadd.s32 %v1853_v30, %v463_v17  ;;  %v795_v0 = vadd.f32 %v763_v61, %v676_v41 }
  0xd8   : > { %1198 = vmatprep.subr.bf16.mxu0 %v1197_v60  ;;  %v882_v1 = vsel %vm837_vm2, %v1872_v40, 0.0  ;;  %v481_v2 = vadd.s32 %v1853_v30, %v464_v18  ;;  %v465_v3 = vadd.s32 96, %v1824_v10  ;;  %v466_v51 = vadd.s32 104, %v1824_v10 }
  0xd9   : > { %v912_v4 = vadd.f32 %v880_v21, %v793_v62  ;;  %vm516_vm3 = vcmp.eq.s32.totalorder %v480_v63, %v1837_v22  ;;  %vm602_vm4 = vcmp.eq.s32.totalorder %v480_v63, %v1841_v24  ;;  %vm721_vm5 = vcmp.eq.s32.totalorder %v480_v63, %v1845_v26 }
  0xda   : > { %v914_v5 = vadd.f32 %v882_v1, %v795_v0  ;;  %vm518_vm6 = vcmp.eq.s32.totalorder %v481_v2, %v1837_v22  ;;  %v560_v6 = vsel %vm516_vm3, %v1839_v23, 0.0  ;;  %vm604_vm7 = vcmp.eq.s32.totalorder %v481_v2, %v1841_v24 }
  0xdb   : > { %v562_v7 = vsel %vm518_vm6, %v1839_v23, 0.0  ;;  %v647_v8 = vsel %vm602_vm4, %v1843_v25, 0.0  ;;  %v649_v9 = vsel %vm604_vm7, %v1843_v25, 0.0  ;;  %vm723_vm8 = vcmp.eq.s32.totalorder %v481_v2, %v1845_v26 }
  0xdc   : > { %v1199_v11 = vpack.c.bf16 %v914_v5, %v912_v4  ;;  %v679_v12 = vadd.f32 %v647_v8, %v560_v6  ;;  %v681_v13 = vadd.f32 %v649_v9, %v562_v7  ;;  %v766_v14 = vsel %vm721_vm5, %v1847_v27, 0.0 }
  0xdd   : > { %v768_v15 = vsel %vm723_vm8, %v1847_v27, 0.0  ;;  %vm840_vm9 = vcmp.eq.s32.totalorder %v480_v63, %v1849_v28  ;;  %vm842_vm10 = vcmp.eq.s32.totalorder %v481_v2, %v1849_v28  ;;  %vm515_vm11 = vcmp.eq.s32.totalorder %v480_v63, %v1855_v31 }
  0xde   : > { %1200 = vmatpush1.bf16.msra.mxu0 %v1199_v11  ;;  %v798_v16 = vadd.f32 %v766_v14, %v679_v12  ;;  %v800_v17 = vadd.f32 %v768_v15, %v681_v13  ;;  %v885_v18 = vsel %vm840_vm9, %v1851_v29, 0.0  ;;  %v887_v19 = vsel %vm842_vm10, %v1851_v29, 0.0 }
  0xdf   : > { %vm517_vm12 = vcmp.eq.s32.totalorder %v481_v2, %v1855_v31  ;;  %v559_v20 = vsel %vm515_vm11, %v1857_v32, 0.0  ;;  %vm601_vm13 = vcmp.eq.s32.totalorder %v480_v63, %v1859_v33  ;;  %vm603_vm14 = vcmp.eq.s32.totalorder %v481_v2, %v1859_v33 }
  0xe0   : > { %v917_v34 = vadd.f32 %v885_v18, %v798_v16  ;;  %v919_v35 = vadd.f32 %v887_v19, %v800_v17  ;;  %v561_v42 = vsel %vm517_vm12, %v1857_v32, 0.0  ;;  %v646_v43 = vsel %vm601_vm13, %v1864_v36, 0.0 }
  0xe1   : > { %v648_v44 = vsel %vm603_vm14, %v1864_v36, 0.0  ;;  %v678_v45 = vadd.f32 %v646_v43, %v559_v20  ;;  %vm720_vm15 = vcmp.eq.s32.totalorder %v480_v63, %v1866_v37  ;;  %vm722_vm0 = vcmp.eq.s32.totalorder %v481_v2, %v1866_v37 }
  0xe2   : > { %v1201_v46 = vpack.c.bf16 %v919_v35, %v917_v34  ;;  %v680_v47 = vadd.f32 %v648_v44, %v561_v42  ;;  %v765_v48 = vsel %vm720_vm15, %v1868_v38, 0.0  ;;  %v767_v49 = vsel %vm722_vm0, %v1868_v38, 0.0 }
  0xe3   : > { %v797_v50 = vadd.f32 %v765_v48, %v678_v45  ;;  %vm839_vm1 = vcmp.eq.s32.totalorder %v480_v63, %v1870_v39  ;;  %vm841_vm2 = vcmp.eq.s32.totalorder %v481_v2, %v1870_v39  ;;  %v482_v55 = vadd.s32 %v1853_v30, %v465_v3 }
  0xe4   : > { %1202 = vmatprep.subr.bf16.mxu0 %v1201_v46  ;;  %v799_v52 = vadd.f32 %v767_v49, %v680_v47  ;;  %v884_v53 = vsel %vm839_vm1, %v1872_v40, 0.0  ;;  %v886_v54 = vsel %vm841_vm2, %v1872_v40, 0.0  ;;  %v483_v57 = vadd.s32 %v1853_v30, %v466_v51 }
  0xe5   : > { %v916_v56 = vadd.f32 %v884_v53, %v797_v50  ;;  %v467_v58 = vadd.s32 112, %v1824_v10  ;;  %v468_v59 = vadd.s32 120, %v1824_v10  ;;  %vm520_vm3 = vcmp.eq.s32.totalorder %v482_v55, %v1837_v22 }
  0xe6   : > { %v918_v60 = vadd.f32 %v886_v54, %v799_v52  ;;  %vm606_vm4 = vcmp.eq.s32.totalorder %v482_v55, %v1841_v24  ;;  %vm725_vm5 = vcmp.eq.s32.totalorder %v482_v55, %v1845_v26  ;;  %vm522_vm6 = vcmp.eq.s32.totalorder %v483_v57, %v1837_v22 }
  0xe7   : > { %v564_v41 = vsel %vm520_vm3, %v1839_v23, 0.0  ;;  %vm608_vm7 = vcmp.eq.s32.totalorder %v483_v57, %v1841_v24  ;;  %v651_v61 = vsel %vm606_vm4, %v1843_v25, 0.0  ;;  %v566_v21 = vsel %vm522_vm6, %v1839_v23, 0.0 }
  0xe8   : > { %v1203_v62 = vpack.c.bf16 %v918_v60, %v916_v56  ;;  %v653_v10 = vsel %vm608_vm7, %v1843_v25, 0.0  ;;  %v683_v63 = vadd.f32 %v651_v61, %v564_v41  ;;  %vm727_vm8 = vcmp.eq.s32.totalorder %v483_v57, %v1845_v26 }
  0xe9   : > { %v685_v0 = vadd.f32 %v653_v10, %v566_v21  ;;  %v770_v1 = vsel %vm725_vm5, %v1847_v27, 0.0  ;;  %vm844_vm9 = vcmp.eq.s32.totalorder %v482_v55, %v1849_v28  ;;  %v772_v2 = vsel %vm727_vm8, %v1847_v27, 0.0 }
  0xea   : > { %1204 = vmatpush1.bf16.msra.mxu0 %v1203_v62  ;;  %v802_v3 = vadd.f32 %v770_v1, %v683_v63  ;;  %vm846_vm10 = vcmp.eq.s32.totalorder %v483_v57, %v1849_v28  ;;  %v889_v4 = vsel %vm844_vm9, %v1851_v29, 0.0  ;;  %vm519_vm11 = vcmp.eq.s32.totalorder %v482_v55, %v1855_v31  ;;  %v928_v62 = vld [vmem:[%s225_s22] sm:$0xf] }
  0xeb   : > { %v804_v5 = vadd.f32 %v772_v2, %v685_v0  ;;  %v891_v6 = vsel %vm846_vm10, %v1851_v29, 0.0  ;;  %vm521_vm12 = vcmp.eq.s32.totalorder %v483_v57, %v1855_v31  ;;  %v563_v8 = vsel %vm519_vm11, %v1857_v32, 0.0 }
  0xec   : > { %v921_v7 = vadd.f32 %v889_v4, %v802_v3  ;;  %v565_v9 = vsel %vm521_vm12, %v1857_v32, 0.0  ;;  %vm605_vm13 = vcmp.eq.s32.totalorder %v482_v55, %v1859_v33  ;;  %vm607_vm14 = vcmp.eq.s32.totalorder %v483_v57, %v1859_v33 }
  0xed   : > { %v923_v11 = vadd.f32 %v891_v6, %v804_v5  ;;  %v650_v12 = vsel %vm605_vm13, %v1864_v36, 0.0  ;;  %vm724_vm15 = vcmp.eq.s32.totalorder %v482_v55, %v1866_v37  ;;  %v652_v13 = vsel %vm607_vm14, %v1864_v36, 0.0 }
  0xee   : > { %v682_v14 = vadd.f32 %v650_v12, %v563_v8  ;;  %vm726_vm0 = vcmp.eq.s32.totalorder %v483_v57, %v1866_v37  ;;  %v769_v15 = vsel %vm724_vm15, %v1868_v38, 0.0  ;;  %v684_v17 = vadd.f32 %v652_v13, %v565_v9 }
  0xef   : > { %v1205_v16 = vpack.c.bf16 %v923_v11, %v921_v7  ;;  %v771_v18 = vsel %vm726_vm0, %v1868_v38, 0.0  ;;  %vm843_vm1 = vcmp.eq.s32.totalorder %v482_v55, %v1870_v39  ;;  %vm845_vm2 = vcmp.eq.s32.totalorder %v483_v57, %v1870_v39 }
  0xf0   : > { %v801_v19 = vadd.f32 %v769_v15, %v682_v14  ;;  %v888_v20 = vsel %vm843_vm1, %v1872_v40, 0.0  ;;  %v484_v34 = vadd.s32 %v1853_v30, %v467_v58  ;;  %v803_v35 = vadd.f32 %v771_v18, %v684_v17 }
  0xf1   : > { %1206 = vmatprep.subr.bf16.mxu0 %v1205_v16  ;;  %v890_v42 = vsel %vm845_vm2, %v1872_v40, 0.0  ;;  %v485_v43 = vadd.s32 %v1853_v30, %v468_v59 }
  0xf2   : > { %v920_v44 = vadd.f32 %v888_v20, %v801_v19  ;;  %vm524_vm3 = vcmp.eq.s32.totalorder %v484_v34, %v1837_v22  ;;  %vm610_vm4 = vcmp.eq.s32.totalorder %v484_v34, %v1841_v24  ;;  %vm729_vm5 = vcmp.eq.s32.totalorder %v484_v34, %v1845_v26 }
  0xf3   : > { %v922_v45 = vadd.f32 %v890_v42, %v803_v35  ;;  %vm526_vm6 = vcmp.eq.s32.totalorder %v485_v43, %v1837_v22  ;;  %v568_v46 = vsel %vm524_vm3, %v1839_v23, 0.0  ;;  %vm612_vm7 = vcmp.eq.s32.totalorder %v485_v43, %v1841_v24 }
  0xf4   : > { %v570_v47 = vsel %vm526_vm6, %v1839_v23, 0.0  ;;  %v655_v48 = vsel %vm610_vm4, %v1843_v25, 0.0  ;;  %v657_v30 = vsel %vm612_vm7, %v1843_v25, 0.0  ;;  %vm731_vm8 = vcmp.eq.s32.totalorder %v485_v43, %v1845_v26 }
  0xf5   : > { %v1207_v49 = vpack.c.bf16 %v922_v45, %v920_v44  ;;  %v687_v50 = vadd.f32 %v655_v48, %v568_v46  ;;  %v689_v51 = vadd.f32 %v657_v30, %v570_v47  ;;  %v774_v52 = vsel %vm729_vm5, %v1847_v27, 0.0 }
  0xf6   : > { %v776_v53 = vsel %vm731_vm8, %v1847_v27, 0.0  ;;  %vm848_vm9 = vcmp.eq.s32.totalorder %v484_v34, %v1849_v28  ;;  %vm850_vm10 = vcmp.eq.s32.totalorder %v485_v43, %v1849_v28  ;;  %vm523_vm11 = vcmp.eq.s32.totalorder %v484_v34, %v1855_v31 }
  0xf7   : > { %1208 = vmatpush1.bf16.msra.mxu0 %v1207_v49  ;;  %v806_v22 = vadd.f32 %v774_v52, %v687_v50  ;;  %v808_v23 = vadd.f32 %v776_v53, %v689_v51  ;;  %v893_v24 = vsel %vm848_vm9, %v1851_v29, 0.0  ;;  %v895_v25 = vsel %vm850_vm10, %v1851_v29, 0.0 }
  0xf8   : > { %vm525_vm12 = vcmp.eq.s32.totalorder %v485_v43, %v1855_v31  ;;  %v567_v26 = vsel %vm523_vm11, %v1857_v32, 0.0  ;;  %vm609_vm13 = vcmp.eq.s32.totalorder %v484_v34, %v1859_v33  ;;  %vm611_vm14 = vcmp.eq.s32.totalorder %v485_v43, %v1859_v33 }
  0xf9   : > { %v925_v27 = vadd.f32 %v893_v24, %v806_v22  ;;  %v927_v54 = vadd.f32 %v895_v25, %v808_v23  ;;  %v569_v28 = vsel %vm525_vm12, %v1857_v32, 0.0  ;;  %v654_v55 = vsel %vm609_vm13, %v1864_v36, 0.0 }
  0xfa   : > { %v656_v56 = vsel %vm611_vm14, %v1864_v36, 0.0  ;;  %v686_v57 = vadd.f32 %v654_v55, %v567_v26  ;;  %vm728_vm15 = vcmp.eq.s32.totalorder %v484_v34, %v1866_v37  ;;  %vm730_vm0 = vcmp.eq.s32.totalorder %v485_v43, %v1866_v37 }
  0xfb   : > { %v1209_v29 = vpack.c.bf16 %v927_v54, %v925_v27  ;;  %v688_v31 = vadd.f32 %v656_v56, %v569_v28  ;;  %v773_v58 = vsel %vm728_vm15, %v1868_v38, 0.0  ;;  %v775_v33 = vsel %vm730_vm0, %v1868_v38, 0.0 }
  0xfc   : > { %v805_v59 = vadd.f32 %v773_v58, %v686_v57  ;;  %vm847_vm1 = vcmp.eq.s32.totalorder %v484_v34, %v1870_v39  ;;  %vm849_vm2 = vcmp.eq.s32.totalorder %v485_v43, %v1870_v39 }
  0xfd   : > { %1210 = vmatprep.subr.bf16.mxu0 %v1209_v29  ;;  %v807_v32 = vadd.f32 %v775_v33, %v688_v31  ;;  %v892_v36 = vsel %vm847_vm1, %v1872_v40, 0.0  ;;  %v894_v60 = vsel %vm849_vm2, %v1872_v40, 0.0 }
  0xfe   : > { %v924_v41 = vadd.f32 %v892_v36, %v805_v59 }
  0xff   : > { %v926_v37 = vadd.f32 %v894_v60, %v807_v32 }
 0x101   : > { %v1211_v61 = vpack.c.bf16 %v926_v37, %v924_v41 }
 0x103   : > { %1212 = vmatpush1.bf16.msra.mxu0 %v1211_v61 }
 0x106   : > { %994 = vmatmul.mubr.f32.vlgmr.msra.gmra.mrb[0].mxu0 %v928_v62 }
 0x1d4   : > { %1002 = sbr.rel (%p1164_p4) target bundleno = 478 (0x1de), region = 44 }
 0x1d9   : > { %v995_v21 = vpop.f32.mrb[0].mxu0 }
 0x1da   : > { %v997_v38 = vpop.f32.mrb[1].mxu0 }
 0x1db   : > { %v1005_v10 = vcombine.low %v995_v21, %v997_v38 }
 0x1dd   : > { %1007 = vst [vmem:[%s1722_s16] sm:$0xff] %v1005_v10 }
 0x1de PF: > { %1011 = sbr.rel (%p277_p7) target bundleno = 488 (0x1e8), region = 48  ;;  %v1015_v40 = vcombine.low (!%p277_p7), %v995_v21, %v997_v38 }
 0x1e4   : > { %v1012_v39 = vld [vmem:[%s1722_s16] sm:$0xff] (!%p277_p7) }
 0x1e5   : > { %v1017_v63 = vadd.f32 %v1015_v40, %v1012_v39 }
 0x1e7   : > { %1018 = vst [vmem:[%s1722_s16] sm:$0xff] %v1017_v63 }
 0x1e8 PF: > { %p1020_p9 = pnand %p1170_p5, %p277_p7 }
 0x1e9   : > { %v1519_v0 = vmov (!%p1020_p9), 0.0  }
 0x1ea   : > { %1023 = sbr.rel (%p1020_p9) target bundleno = 497 (0x1f1), region = 52  ;;  %1024 = vst [vmem:[%s1722_s16] sm:$0xff] (!%p1020_p9), %v1519_v0 }
 0x1f1 PF: > { %s2186_s9 = scalar_lea.hbm %s2248_s4, %s1813_s15  ;;  %s1042_s22 = sshll.u32 %s1722_s16, 4  ;;  %s1043_s22 = int_to_ptr.vmem [resolvable:$true] %s1042_s22 }
 0x1f2   : > { %s1026_s13 = scalar_lea.sflag [#allocation9], %s252_s28  ;;  %s1387_s29 = scalar_lea.vmem %s1043_s22, 128 }
 0x1f3   : > { %p1388_p13 = scmp.ne.s32.totalorder %s1043_s22, %s1387_s29  ;;  %p2279_p0 = scmp.ne.s32.totalorder %s2259_s21, 0 }
 0x1f4   : > { %s1520_s17 = smov [#allocation10]  }
 0x1f5   : > { %p1389_p6 = pnand %p1388_p13, %p2279_p0  ;;  %s1391_s18 = sshll.u32 %s1520_s17, 4  ;;  %s1392_s18 = int_to_ptr.vmem [resolvable:$false] %s1391_s18 }
 0x1f6   : > { %s1393_s11 = scalar_lea.vmem %s1392_s18, 256  ;;  %p1394_p10 = scmp.lt.s32.totalorder %s1043_s22, %s1392_s18 }
 0x1f7   : > { %p1390_p8 = pneg %p1389_p6  ;;  %p1395_p1 = scmp.lt.s32.totalorder %s1393_s11, %s1387_s29 }
 0x1f9   : > { %p1396_p3 = por %p1395_p1, %p1394_p10 }
 0x1fb   : > { %p1397_p11 = pnand %p1396_p3, %p1390_p8 }
 0x1fd   : > { %1400 = shalt.err (!%p1397_p11)
}
 0x1fe   : > { %s1401_s28 = scalar_lea.hbm %s2186_s9, 128  ;;  %s1405_s16 = scalar_lea.hbm %s2248_s4, 256 }
 0x1ff   : > { %p1402_p12 = scmp.ne.s32.totalorder %s2186_s9, %s1401_s28  ;;  %p1406_p4 = scmp.lt.u32.totalorder %s2186_s9, %s2248_s4 }
 0x200   : > { %p1407_p5 = scmp.lt.u32.totalorder %s1405_s16, %s1401_s28  ;;  %p1409_p13 = scmp.lt.u32.totalorder %s1401_s28, %s2186_s9 }
 0x201   : > { %p1403_p2 = pnand %p1402_p12, %p2279_p0 }
 0x202   : > { %p1408_p9 = por %p1407_p5, %p1406_p4 }
 0x203   : > { %p1404_p7 = pneg %p1403_p2 }
 0x204   : > { %p1410_p6 = por %p1409_p13, %p1408_p9 }
 0x206   : > { %p1411_p8 = pnand %p1410_p6, %p1404_p7 }
 0x208   : > { %1414 = shalt.err (!%p1411_p8)
}
 0x209   : > { %1225 = dma.vmem_to_hbm [thread:$0]  (%p2279_p0), %s1043_s22, 128, %s2186_s9, %s1026_s13  }
 0x20a PF: > { %p1238_p10 = scmp.ge.s32.totalorder %s1511_s7, 2  ;;  %s1054_s10 = sand.u32 1, %s1471_s1  }
 0x20b   : > { %p2280_p1 = scmp.ne.s32.totalorder %s2260_s23, 0  ;;  %s1055_s30 = scalar_lea.sflag [#allocation9], %s1054_s10 }
 0x20d   : > { %p1234_p3 = pnand %p1238_p10, %p2280_p1 }
 0x20f   : > { %1466 = dma.done.wait (!%p1234_p3), %s1055_s30, 128  }
 0x210   : > { %1468 = vsyncadd (!%p1234_p3), %s1055_s30, 4294967168  ;;  %s30_s7 = sadd.s32 1, %s1511_s7   ;;  %s2281_s21 = sld [smem:[#allocation16_spill]] }
 0x211   : > { %p27_p11 = scmp.ge.s32.totalorder %s30_s7, 6   ;;  %s2282_s28 = sld [smem:[#allocation19_spill]] }
 0x212   : > { %s2283_s12 = sld [smem:[#allocation17_spill]]  ;;  %s2284_s19 = sld [smem:[#allocation18_spill]] }
 0x213   : > { %s2285_s1 = smov %s1475_s24  ;;  %s2286_s24 = smov %s1479_s25 }
 0x214   : > { %s2287_s25 = smov %s1633_s20  ;;  %s2288_s26 = smov %s1487_s27 }
 0x215   : > { %s2290_s29 = smov %s1503_s5  ;;  %s2291_s30 = smov %s1507_s6 }
 0x216   : > { %s2289_s27 = smov %s2281_s21  ;;  %29 = sbr.rel (!%p27_p11) target bundleno = 34 (0x22), region = 108 }
 0x218   : > { %s2292_s5 = smov %s2283_s12  ;;  %s2293_s6 = smov %s2284_s19 }
 0x21d   :  { %1060 = vsyncpa [#allocation8], 1 }
 0x21e   :  { %1062 = vsyncpa [#allocation8 + $0x1], 1 }
 0x21f   :  { %1063 = vsyncpa [#allocation9], 1 }
 0x220   :  { %1065 = vsyncpa [#allocation9 + $0x1], 1 }

</bundles_post_ra>
